<compile_context>
chip_gen: v6e
topology: v6e:2x2x1
jax: 0.10.0
libtpu: 0.0.40
codegen_flags: <defaults>
</compile_context>

<pallas_src>
import functools

import jax
import jax.numpy as jnp
from jax.experimental import pallas as pl
from jax.experimental.pallas import tpu as pltpu


# ---------------------------------------------------------------------------
# Small helpers
# ---------------------------------------------------------------------------
def _round_up(x, m):
    return (x + m - 1) // m * m


@functools.lru_cache(maxsize=None)
def _vmem_limit_bytes():
    """Per-call VMEM budget ~= half of physical VMEM (64 MiB on v5e/v6e,
    32 MiB on v7x whose VMEM is only 64 MiB).  Falls back to 64 MiB."""
    try:
        return int(pltpu.get_tpu_info().vmem_capacity_bytes) // 2
    except Exception:  # query unavailable (older jax / no TPU info)
        return 64 * 1024 * 1024


def _choose_tile(total, desired, align=128):
    """Largest tile <= desired that divides `total` exactly.

    Prefers lane-dense multiples of `align`.  Never silently falls back to the
    full axis unless the whole axis already fits within `desired`, so a
    non-divisible dimension can no longer produce a VMEM-overflowing block.
    """
    if total <= desired:
        return total
    t = (desired // align) * align
    while t >= align:
        if total % t == 0:
            return t
        t -= align
    for t in range(min(desired, total), 0, -1):
        if total % t == 0:
            return t
    return 1


# ---------------------------------------------------------------------------
# In-kernel math helpers (only guaranteed-lowerable ops)
# ---------------------------------------------------------------------------
def _erf(x):
    # Abramowitz & Stegun 7.1.26, |error| < 1.5e-7 with an exact reciprocal.
    a1, a2, a3, a4, a5 = (0.254829592, -0.284496736, 1.421413741,
                          -1.453152027, 1.061405429)
    p = 0.3275911
    ax = jnp.abs(x)
    # EUP approximate reciprocal: moves the divide off the (filler-bound) VALU
    # onto the otherwise-idle EUP slot; polynomial error dominates anyway.
    t = pl.reciprocal(1.0 + p * ax, approx=True)
    poly = ((((a5 * t + a4) * t + a3) * t + a2) * t + a1) * t
    y = 1.0 - poly * jnp.exp(-ax * ax)
    return jnp.where(x >= 0, y, -y)


def _gelu_exact(x):
    # Matches PyTorch nn.GELU() default (erf GELU), not the tanh approximation.
    return 0.5 * x * (1.0 + _erf(x * 0.7071067811865476))


def _to_bf16(v):
    return v if v.dtype == jnp.bfloat16 else v.astype(jnp.bfloat16)


# ---------------------------------------------------------------------------
# Generic tiled linear:  o = act(x @ w + b), bf16 MXU inputs, f32 accumulation
# ---------------------------------------------------------------------------
def _matmul_kernel(x_ref, w_ref, b_ref, o_ref, acc_ref, *, activation):
    k = pl.program_id(2)

    @pl.when(k == 0)
    def _():
        acc_ref[...] = jnp.zeros_like(acc_ref)

    acc_ref[...] += jnp.dot(_to_bf16(x_ref[...]), _to_bf16(w_ref[...]),
                            preferred_element_type=jnp.float32)

    @pl.when(k == pl.num_programs(2) - 1)
    def _():
        out = acc_ref[...] + b_ref[...].astype(jnp.float32)
        if activation == "gelu":
            out = _gelu_exact(out)
        elif activation == "sigmoid":
            out = jax.nn.sigmoid(out)
        o_ref[...] = out.astype(o_ref.dtype)


def pallas_linear(x, w, b, activation=None, *, tm=256, tn=256, tk=256,
                  out_dtype=jnp.float32):
    M0, K = x.shape
    Kw, N = w.shape
    assert K == Kw, (K, Kw)

    # Rows: zero-pad up to a sublane-aligned tile multiple so the MXU sees
    # dense LHS tiles (handles e.g. M = B*N+1 from the prepended mask token)
    # instead of shrinking the tile or falling back to a whole-axis block.
    tm = min(tm, _round_up(M0, 16))
    Mp = _round_up(M0, tm)
    if Mp != M0:
        x = jnp.pad(x, ((0, Mp - M0), (0, 0)))
    tn = _choose_tile(N, tn)
    tk = _choose_tile(K, tk)
    grid = (Mp // tm, N // tn, K // tk)

    # v5e note: for the big weight-streaming matmul, pipeline_mode=pl.Buffered(3)
    # on the weight BlockSpec can further hide DMA issue latency.
    out = pl.pallas_call(
        functools.partial(_matmul_kernel, activation=activation),
        out_shape=jax.ShapeDtypeStruct((Mp, N), out_dtype),
        grid_spec=pltpu.PrefetchScalarGridSpec(
            num_scalar_prefetch=0,
            grid=grid,
            in_specs=[
                pl.BlockSpec((tm, tk), lambda i, j, k: (i, k)),
                pl.BlockSpec((tk, tn), lambda i, j, k: (k, j)),
                pl.BlockSpec((1, tn), lambda i, j, k: (0, j)),
            ],
            out_specs=pl.BlockSpec((tm, tn), lambda i, j, k: (i, j)),
            scratch_shapes=[pltpu.VMEM((tm, tn), jnp.float32)],
        ),
        compiler_params=pltpu.CompilerParams(
            dimension_semantics=("parallel", "parallel", "arbitrary"),
            vmem_limit_bytes=_vmem_limit_bytes(),
        ),
    )(x, w, b.reshape(1, N))
    return out if Mp == M0 else out[:M0]


# ---------------------------------------------------------------------------
# Fused encoder block: out = x + MLP(LayerNorm(x)) + pos   (single pallas_call)
# ---------------------------------------------------------------------------
def _encoder_block_kernel(x_ref, pos_ref, g_ref, bln_ref, w1_ref, b1_ref,
                          w2_ref, b2_ref, o_ref):
    x = x_ref[...].astype(jnp.float32)
    mu = jnp.mean(x, axis=-1, keepdims=True)
    var = jnp.mean(jnp.square(x - mu), axis=-1, keepdims=True)
    h = (x - mu) * jax.lax.rsqrt(var + 1e-5)
    h = h * g_ref[...].astype(jnp.float32) + bln_ref[...].astype(jnp.float32)
    h = jnp.dot(_to_bf16(h), _to_bf16(w1_ref[...]),
                preferred_element_type=jnp.float32) + b1_ref[...]
    h = _gelu_exact(h)
    h = jnp.dot(_to_bf16(h), _to_bf16(w2_ref[...]),
                preferred_element_type=jnp.float32) + b2_ref[...]
    o_ref[...] = (x + h + pos_ref[...].astype(jnp.float32)).astype(o_ref.dtype)


def pallas_encoder_block(x, pos, ln_g, ln_b, w1, b1, w2, b2, *, tr=256,
                         out_dtype=jnp.bfloat16):
    M0, D = x.shape
    Hd = w1.shape[1]
    tr = min(tr, _round_up(M0, 16))
    Mp = _round_up(M0, tr)
    if Mp != M0:
        x = jnp.pad(x, ((0, Mp - M0), (0, 0)))
        pos = jnp.pad(pos, ((0, Mp - M0), (0, 0)))
    grid = (Mp // tr,)
    # Weights stay resident (constant block index); on v7x, if VMEM-tight with
    # real model sizes, tile Hd or single-buffer the weight BlockSpecs.
    out = pl.pallas_call(
        _encoder_block_kernel,
        out_shape=jax.ShapeDtypeStruct((Mp, D), out_dtype),
        grid_spec=pltpu.PrefetchScalarGridSpec(
            num_scalar_prefetch=0,
            grid=grid,
            in_specs=[
                pl.BlockSpec((tr, D), lambda i: (i, 0)),
                pl.BlockSpec((tr, D), lambda i: (i, 0)),
                pl.BlockSpec((1, D), lambda i: (0, 0)),
                pl.BlockSpec((1, D), lambda i: (0, 0)),
                pl.BlockSpec((D, Hd), lambda i: (0, 0)),
                pl.BlockSpec((1, Hd), lambda i: (0, 0)),
                pl.BlockSpec((Hd, D), lambda i: (0, 0)),
                pl.BlockSpec((1, D), lambda i: (0, 0)),
            ],
            out_specs=pl.BlockSpec((tr, D), lambda i: (i, 0)),
        ),
        compiler_params=pltpu.CompilerParams(
            dimension_semantics=("parallel",),
            vmem_limit_bytes=_vmem_limit_bytes(),
        ),
    )(x, pos, ln_g.reshape(1, D), ln_b.reshape(1, D),
      w1, b1.reshape(1, Hd), w2, b2.reshape(1, D))
    return out if Mp == M0 else out[:M0]


# ---------------------------------------------------------------------------
# Row-tiled loss reduction: sum((a-b)^2) and sum(|a-b|)
#   - inner loop: elementwise accumulation into f32 VMEM scratch (VPU only)
#   - last grid step: single cross-lane reduce + SMEM write
# ---------------------------------------------------------------------------
def _loss_kernel(a_ref, b_ref, o_ref, sq_acc, abs_acc):
    i = pl.program_id(0)

    @pl.when(i == 0)
    def _():
        sq_acc[...] = jnp.zeros_like(sq_acc)
        abs_acc[...] = jnp.zeros_like(abs_acc)

    d = a_ref[...].astype(jnp.float32) - b_ref[...].astype(jnp.float32)
    sq_acc[...] += d * d
    abs_acc[...] += jnp.abs(d)

    @pl.when(i == pl.num_programs(0) - 1)
    def _():
        o_ref[0] = jnp.sum(sq_acc[...])
        o_ref[1] = jnp.sum(abs_acc[...])


def pallas_loss_sums(a, b, *, tr=512):
    M0, K = a.shape
    tr = min(tr, _round_up(M0, 8))
    Mp = _round_up(M0, tr)
    if Mp != M0:
        a = jnp.pad(a, ((0, Mp - M0), (0, 0)))   # padded rows give d == 0
        b = jnp.pad(b, ((0, Mp - M0), (0, 0)))
    grid = (Mp // tr,)
    return pl.pallas_call(
        _loss_kernel,
        out_shape=jax.ShapeDtypeStruct((2,), jnp.float32),
        grid_spec=pltpu.PrefetchScalarGridSpec(
            num_scalar_prefetch=0,
            grid=grid,
            in_specs=[
                pl.BlockSpec((tr, K), lambda i: (i, 0)),
                pl.BlockSpec((tr, K), lambda i: (i, 0)),
            ],
            out_specs=pl.BlockSpec(memory_space=pltpu.SMEM),
            scratch_shapes=[pltpu.VMEM((tr, K), jnp.float32),
                            pltpu.VMEM((tr, K), jnp.float32)],
        ),
        compiler_params=pltpu.CompilerParams(
            # Sequential accumulation across the grid axis: must never be
            # marked "parallel"/core-sharded without changing the scheme.
            dimension_semantics=("arbitrary",),
            vmem_limit_bytes=_vmem_limit_bytes(),
        ),
    )(a, b)


# ---------------------------------------------------------------------------
# Plain-JAX glue
# ---------------------------------------------------------------------------
def patchify(images, p):
    """NCHW -> (B, N_patches, p*p*C)."""
    B, C, H, W = images.shape
    x = images.reshape(B, C, H // p, p, W // p, p)
    x = x.transpose(0, 2, 4, 3, 5, 1)          # B, H/p, W/p, p, p, C
    return x.reshape(B, (H // p) * (W // p), p * p * C)


def init_params(key, *, C, H, W, p, D, enc_hidden, dec_dim):
    N = (H // p) * (W // p)
    Pd = p * p * C
    ks = jax.random.split(key, 8)
    s = 0.02
    wdt = jnp.bfloat16   # matmul weights in bf16: halves HBM traffic, MXU-native
    return dict(
        proj_w=(s * jax.random.normal(ks[0], (Pd, D), jnp.float32)).astype(wdt),
        proj_b=jnp.zeros((D,), jnp.float32),
        pos_embed=s * jax.random.normal(ks[1], (N, D), jnp.float32),
        mask_token=s * jax.random.normal(ks[2], (1, Pd), jnp.float32),
        enc_ln_g=jnp.ones((D,), jnp.float32),
        enc_ln_b=jnp.zeros((D,), jnp.float32),
        enc_w1=(s * jax.random.normal(ks[3], (D, enc_hidden), jnp.float32)).astype(wdt),
        enc_b1=jnp.zeros((enc_hidden,), jnp.float32),
        enc_w2=(s * jax.random.normal(ks[4], (enc_hidden, D), jnp.float32)).astype(wdt),
        enc_b2=jnp.zeros((D,), jnp.float32),
        dec_w1=(s * jax.random.normal(ks[5], (D, dec_dim), jnp.float32)).astype(wdt),
        dec_b1=jnp.zeros((dec_dim,), jnp.float32),
        dec_w2=(s * jax.random.normal(ks[6], (N * dec_dim, C * H * W),
                                      jnp.float32)).astype(wdt),
        dec_b2=jnp.zeros((C * H * W,), jnp.float32),
    )


# ---------------------------------------------------------------------------
# Forward pass == MaskedAutoencoder.calculate_loss(images, test=False)
# ---------------------------------------------------------------------------
def mae_forward(params, images, mask_key, *, p, D, dec_dim, mask_ratio=0.5):
    # TODO(synk): train/test augmentation pipelines are stochastic image ops with
    # no clean Pallas equivalent; identity augmentation is used here.
    augmented_images = images

    B, C, H, W = images.shape
    patches = patchify(augmented_images, p)                    # (B, N, Pd)
    _, N, Pd = patches.shape
    num_mask = int(N * mask_ratio)
    num_unmask = N - num_mask

    # ---- patch encoder -----------------------------------------------------
    # Prepend the single mask token as row 0 so its projection is computed once
    # inside the same kernel launch; row count is zero-padded to a tile
    # multiple inside pallas_linear (no whole-axis / odd-M block).
    proj_in = jnp.concatenate(
        [params["mask_token"], patches.reshape(B * N, Pd)], axis=0)
    proj_out = pallas_linear(proj_in, params["proj_w"], params["proj_b"])
    mask_token_emb = proj_out[0]                               # (D,)
    emb = proj_out[1:].reshape(B, N, D)

    pos = params["pos_embed"]                                  # (N, D)
    emb = emb + pos[None]

    rand = jax.random.uniform(mask_key, (B, N))
    ids = jnp.argsort(rand, axis=-1).astype(jnp.int32)
    mask_indices = ids[:, :num_mask]                           # (B, Nm)
    unmask_indices = ids[:, num_mask:]                         # (B, Nu)

    # TODO(synk): for large models, fuse these gathers into the kernels via
    # scalar-prefetched indices (PrefetchScalarGridSpec + pl.Element) to avoid
    # the HBM round trips; at these sizes plain-JAX glue is fine.
    pos_b = jnp.broadcast_to(pos[None], (B, N, D))
    unm_idx_d = jnp.broadcast_to(unmask_indices[..., None], (B, num_unmask, D))
    msk_idx_d = jnp.broadcast_to(mask_indices[..., None], (B, num_mask, D))
    unmasked_embeddings = jnp.take_along_axis(emb, unm_idx_d, axis=1)
    unmasked_positions = jnp.take_along_axis(pos_b, unm_idx_d, axis=1)
    masked_positions = jnp.take_along_axis(pos_b, msk_idx_d, axis=1)

    masked_embeddings = (mask_token_emb[None, None, :]
                         + masked_positions).astype(jnp.bfloat16)

    # ---- encoder (fused pre-LN MLP block + residual + positions) ------------
    # Output in bf16: it feeds the decoder matmuls (MXU inputs) directly.
    encoder_outputs = pallas_encoder_block(
        unmasked_embeddings.reshape(B * num_unmask, D),
        unmasked_positions.reshape(B * num_unmask, D),
        params["enc_ln_g"], params["enc_ln_b"],
        params["enc_w1"], params["enc_b1"],
        params["enc_w2"], params["enc_b2"],
        tr=256, out_dtype=jnp.bfloat16,
    ).reshape(B, num_unmask, D)

    decoder_inputs = jnp.concatenate([encoder_outputs, masked_embeddings], axis=1)

    # ---- decoder -> image ----------------------------------------------------
    # d1 is emitted in bf16: it is re-streamed once per N-tile of the dec_w2
    # matmul, so bf16 halves that repeated HBM traffic.
    d1 = pallas_linear(decoder_inputs.reshape(B * N, D), params["dec_w1"],
                       params["dec_b1"], activation="gelu",
                       tm=256, out_dtype=jnp.bfloat16)
    d1 = d1.reshape(B, N * dec_dim)
    # dec_w2 is the big weight: stream it in lane-dense 512-wide tiles with an
    # f32 accumulator (K axis "arbitrary", N axis "parallel" for megacore).
    dimg = pallas_linear(d1, params["dec_w2"], params["dec_b2"],
                         activation="sigmoid", tm=256, tn=512, tk=512,
                         out_dtype=jnp.float32)
    decoder_outputs = dimg.reshape(B, C, H, W)

    # ---- masked-patch reconstruction loss ------------------------------------
    decoder_patches = patchify(decoder_outputs, p)
    msk_idx_p = jnp.broadcast_to(mask_indices[..., None], (B, num_mask, Pd))
    loss_patch = jnp.take_along_axis(patches, msk_idx_p, axis=1)
    loss_output = jnp.take_along_axis(decoder_patches, msk_idx_p, axis=1)

    sums = pallas_loss_sums(
        loss_patch.reshape(B * num_mask, Pd), loss_output.reshape(B * num_mask, Pd))
    count = loss_patch.size
    loss = sums[0] / count
    mae = sums[1] / count

    return (loss, mae, loss_patch, loss_output, augmented_images,
            mask_indices, unmask_indices, decoder_outputs)


# ---------------------------------------------------------------------------
if __name__ == "__main__":
    B, C, H, W = 2, 3, 16, 16
    p, D, enc_hidden, dec_dim = 4, 32, 64, 32

    key = jax.random.PRNGKey(0)
    k_img, k_param, k_mask = jax.random.split(key, 3)

    images = jax.random.uniform(k_img, (B, C, H, W), jnp.float32)
    params = init_params(k_param, C=C, H=H, W=W, p=p, D=D,
                         enc_hidden=enc_hidden, dec_dim=dec_dim)

    fwd = jax.jit(
        lambda prms, imgs, mkey: mae_forward(
            prms, imgs, mkey, p=p, D=D, dec_dim=dec_dim, mask_ratio=0.5
        )
    )

    outs = fwd(params, images, k_mask)
    outs = jax.block_until_ready(outs)

    loss, mae, loss_patch, loss_output, aug, mask_idx, unmask_idx, dec_out = outs
    assert loss_patch.shape == (B, 8, p * p * C)
    assert loss_output.shape == (B, 8, p * p * C)
    assert dec_out.shape == (B, C, H, W)
    assert mask_idx.shape == (B, 8) and unmask_idx.shape == (B, 8)
    assert jnp.isfinite(loss) and jnp.isfinite(mae)
    print("KERNEL_OK")
</pallas_src>

<mosaic_0001>
module attributes {stable_mosaic.version = 11 : i64} {
  func.func @_matmul_kernel(%arg0: i32, %arg1: i32, %arg2: i32, %arg3: memref<48x48xf32, #tpu.memory_space<vmem>>, %arg4: memref<48x32xbf16, #tpu.memory_space<vmem>>, %arg5: memref<1x32xf32, #tpu.memory_space<vmem>>, %arg6: memref<48x32xf32, #tpu.memory_space<vmem>>, %arg7: memref<48x32xf32, #tpu.memory_space<vmem>>) attributes {dimension_semantics = [#tpu.dimension_semantics<parallel>, #tpu.dimension_semantics<parallel>, #tpu.dimension_semantics<arbitrary>], iteration_bounds = array<i64: 1, 1, 1>, scalar_prefetch = 0 : i64, scratch_operands = 1 : i64, tpu.core_type = #tpu.core_type<tc>, window_params = [{transform_indices = @transform_0, window_bounds = array<i64: 48, 48>}, {transform_indices = @transform_1, window_bounds = array<i64: 48, 32>}, {transform_indices = @transform_2, window_bounds = array<i64: 1, 32>}, {transform_indices = @transform_3, window_bounds = array<i64: 48, 32>}]} {
    %c0_i32 = arith.constant 0 : i32
    %0 = arith.cmpi eq, %arg2, %c0_i32 : i32
    %1 = arith.extui %0 : i1 to i32
    %c0_i32_0 = arith.constant 0 : i32
    %2 = arith.cmpi ne, %1, %c0_i32_0 : i32
    scf.if %2 {
      %cst_10 = arith.constant 0.000000e+00 : f32
      %13 = vector.broadcast %cst_10 : f32 to vector<48x32xf32>
      %c0_11 = arith.constant 0 : index
      %c0_12 = arith.constant 0 : index
      %14 = vector.load %arg7[%c0_11, %c0_12] : memref<48x32xf32, #tpu.memory_space<vmem>>, vector<48x32xf32>
      tpu.vector_store %arg7[%c0_11, %c0_12], %13 {strides = array<i32>} : memref<48x32xf32, #tpu.memory_space<vmem>>, vector<48x32xf32>,
    } else {
    }
    %c0 = arith.constant 0 : index
    %c0_1 = arith.constant 0 : index
    %3 = vector.load %arg7[%c0, %c0_1] : memref<48x32xf32, #tpu.memory_space<vmem>>, vector<48x32xf32>
    %c0_2 = arith.constant 0 : index
    %c0_3 = arith.constant 0 : index
    %4 = vector.load %arg3[%c0_2, %c0_3] : memref<48x48xf32, #tpu.memory_space<vmem>>, vector<48x48xf32>
    %5 = arith.truncf %4 : vector<48x48xf32> to vector<48x48xbf16>
    %c0_4 = arith.constant 0 : index
    %c0_5 = arith.constant 0 : index
    %6 = vector.load %arg4[%c0_4, %c0_5] : memref<48x32xbf16, #tpu.memory_space<vmem>>, vector<48x32xbf16>
    %cst = arith.constant dense<0.000000e+00> : vector<48x32xf32>
    %7 = tpu.matmul %5, %6, %cst {dimension_numbers = #tpu.dot_dimension_numbers<[1], [0], [0], [1], [0, 0, 1, 1], [], []>} : vector<48x48xbf16>, vector<48x32xbf16>, vector<48x32xf32> -> vector<48x32xf32>
    %8 = arith.addf %3, %7 : vector<48x32xf32>
    %c0_6 = arith.constant 0 : index
    %c0_7 = arith.constant 0 : index
    %9 = vector.load %arg7[%c0_6, %c0_7] : memref<48x32xf32, #tpu.memory_space<vmem>>, vector<48x32xf32>
    tpu.vector_store %arg7[%c0_6, %c0_7], %8 {strides = array<i32>} : memref<48x32xf32, #tpu.memory_space<vmem>>, vector<48x32xf32>,
    %c0_i32_8 = arith.constant 0 : i32
    %10 = arith.cmpi eq, %arg2, %c0_i32_8 : i32
    %11 = arith.extui %10 : i1 to i32
    %c0_i32_9 = arith.constant 0 : i32
    %12 = arith.cmpi ne, %11, %c0_i32_9 : i32
    scf.if %12 {
      %c0_10 = arith.constant 0 : index
      %c0_11 = arith.constant 0 : index
      %13 = vector.load %arg7[%c0_10, %c0_11] : memref<48x32xf32, #tpu.memory_space<vmem>>, vector<48x32xf32>
      %c0_12 = arith.constant 0 : index
      %c0_13 = arith.constant 0 : index
      %14 = vector.load %arg5[%c0_12, %c0_13] : memref<1x32xf32, #tpu.memory_space<vmem>>, vector<1x32xf32>
      %15 = vector.broadcast %14 : vector<1x32xf32> to vector<48x32xf32>
      %16 = arith.addf %13, %15 : vector<48x32xf32>
      %c0_14 = arith.constant 0 : index
      %c0_15 = arith.constant 0 : index
      %17 = vector.load %arg6[%c0_14, %c0_15] : memref<48x32xf32, #tpu.memory_space<vmem>>, vector<48x32xf32>
      tpu.vector_store %arg6[%c0_14, %c0_15], %16 {strides = array<i32>} : memref<48x32xf32, #tpu.memory_space<vmem>>, vector<48x32xf32>,
    } else {
    }
    return
  }
  func.func @transform_0(%arg0: i32, %arg1: i32, %arg2: i32) -> (i32, i32) {
    %c0_i32 = arith.constant 0 : i32
    return %arg0, %arg2 : i32, i32
  }
  func.func @transform_1(%arg0: i32, %arg1: i32, %arg2: i32) -> (i32, i32) {
    %c0_i32 = arith.constant 0 : i32
    return %arg2, %arg1 : i32, i32
  }
  func.func @transform_2(%arg0: i32, %arg1: i32, %arg2: i32) -> (i32, i32) {
    %c0_i32 = arith.constant 0 : i32
    %c0_i32_0 = arith.constant 0 : i32
    return %c0_i32, %arg1 : i32, i32
  }
  func.func @transform_3(%arg0: i32, %arg1: i32, %arg2: i32) -> (i32, i32) {
    %c0_i32 = arith.constant 0 : i32
    return %arg0, %arg1 : i32, i32
  }
}

module attributes {stable_mosaic.version = 11 : i64} {
  func.func @_encoder_block_kernel(%arg0: i32, %arg1: memref<16x32xf32, #tpu.memory_space<vmem>>, %arg2: memref<16x32xf32, #tpu.memory_space<vmem>>, %arg3: memref<1x32xf32, #tpu.memory_space<vmem>>, %arg4: memref<1x32xf32, #tpu.memory_space<vmem>>, %arg5: memref<32x64xbf16, #tpu.memory_space<vmem>>, %arg6: memref<1x64xf32, #tpu.memory_space<vmem>>, %arg7: memref<64x32xbf16, #tpu.memory_space<vmem>>, %arg8: memref<1x32xf32, #tpu.memory_space<vmem>>, %arg9: memref<16x32xbf16, #tpu.memory_space<vmem>>) attributes {dimension_semantics = [#tpu.dimension_semantics<parallel>], iteration_bounds = array<i64: 1>, scalar_prefetch = 0 : i64, scratch_operands = 0 : i64, tpu.core_type = #tpu.core_type<tc>, window_params = [{transform_indices = @transform_0, window_bounds = array<i64: 16, 32>}, {transform_indices = @transform_1, window_bounds = array<i64: 16, 32>}, {pipeline_mode = #tpu.pipeline_mode<synchronous>, transform_indices = @transform_2, window_bounds = array<i64: 1, 32>}, {pipeline_mode = #tpu.pipeline_mode<synchronous>, transform_indices = @transform_3, window_bounds = array<i64: 1, 32>}, {pipeline_mode = #tpu.pipeline_mode<synchronous>, transform_indices = @transform_4, window_bounds = array<i64: 32, 64>}, {pipeline_mode = #tpu.pipeline_mode<synchronous>, transform_indices = @transform_5, window_bounds = array<i64: 1, 64>}, {pipeline_mode = #tpu.pipeline_mode<synchronous>, transform_indices = @transform_6, window_bounds = array<i64: 64, 32>}, {pipeline_mode = #tpu.pipeline_mode<synchronous>, transform_indices = @transform_7, window_bounds = array<i64: 1, 32>}, {transform_indices = @transform_8, window_bounds = array<i64: 16, 32>}]} {
    %c0 = arith.constant 0 : index
    %c0_0 = arith.constant 0 : index
    %0 = vector.load %arg1[%c0, %c0_0] : memref<16x32xf32, #tpu.memory_space<vmem>>, vector<16x32xf32>
    %cst = arith.constant dense<0.000000e+00> : vector<16xf32>
    %1 = vector.multi_reduction <add>, %0, %cst [1] : vector<16x32xf32> to vector<16xf32>
    %2 = vector.shape_cast %1 : vector<16xf32> to vector<16x1xf32>
    %cst_1 = arith.constant 3.200000e+01 : f32
    %3 = vector.broadcast %cst_1 : f32 to vector<16x1xf32>
    %4 = arith.divf %2, %3 : vector<16x1xf32>
    %5 = vector.broadcast %4 : vector<16x1xf32> to vector<16x32xf32>
    %6 = arith.subf %0, %5 : vector<16x32xf32>
    %7 = arith.mulf %6, %6 : vector<16x32xf32>
    %cst_2 = arith.constant dense<0.000000e+00> : vector<16xf32>
    %8 = vector.multi_reduction <add>, %7, %cst_2 [1] : vector<16x32xf32> to vector<16xf32>
    %9 = vector.shape_cast %8 : vector<16xf32> to vector<16x1xf32>
    %cst_3 = arith.constant 3.200000e+01 : f32
    %10 = vector.broadcast %cst_3 : f32 to vector<16x1xf32>
    %11 = arith.divf %9, %10 : vector<16x1xf32>
    %12 = vector.broadcast %4 : vector<16x1xf32> to vector<16x32xf32>
    %13 = arith.subf %0, %12 : vector<16x32xf32>
    %cst_4 = arith.constant 9.99999974E-6 : f32
    %14 = vector.broadcast %cst_4 : f32 to vector<16x1xf32>
    %15 = arith.addf %11, %14 : vector<16x1xf32>
    %16 = math.rsqrt %15 : vector<16x1xf32>
    %17 = vector.broadcast %16 : vector<16x1xf32> to vector<16x32xf32>
    %18 = arith.mulf %13, %17 : vector<16x32xf32>
    %c0_5 = arith.constant 0 : index
    %c0_6 = arith.constant 0 : index
    %19 = vector.load %arg3[%c0_5, %c0_6] : memref<1x32xf32, #tpu.memory_space<vmem>>, vector<1x32xf32>
    %20 = vector.broadcast %19 : vector<1x32xf32> to vector<16x32xf32>
    %21 = arith.mulf %18, %20 : vector<16x32xf32>
    %c0_7 = arith.constant 0 : index
    %c0_8 = arith.constant 0 : index
    %22 = vector.load %arg4[%c0_7, %c0_8] : memref<1x32xf32, #tpu.memory_space<vmem>>, vector<1x32xf32>
    %23 = vector.broadcast %22 : vector<1x32xf32> to vector<16x32xf32>
    %24 = arith.addf %21, %23 : vector<16x32xf32>
    %25 = arith.truncf %24 : vector<16x32xf32> to vector<16x32xbf16>
    %c0_9 = arith.constant 0 : index
    %c0_10 = arith.constant 0 : index
    %26 = vector.load %arg5[%c0_9, %c0_10] : memref<32x64xbf16, #tpu.memory_space<vmem>>, vector<32x64xbf16>
    %cst_11 = arith.constant dense<0.000000e+00> : vector<16x64xf32>
    %27 = tpu.matmul %25, %26, %cst_11 {dimension_numbers = #tpu.dot_dimension_numbers<[1], [0], [0], [1], [0, 0, 1, 1], [], []>} : vector<16x32xbf16>, vector<32x64xbf16>, vector<16x64xf32> -> vector<16x64xf32>
    %c0_12 = arith.constant 0 : index
    %c0_13 = arith.constant 0 : index
    %28 = vector.load %arg6[%c0_12, %c0_13] : memref<1x64xf32, #tpu.memory_space<vmem>>, vector<1x64xf32>
    %29 = vector.broadcast %28 : vector<1x64xf32> to vector<16x64xf32>
    %30 = arith.addf %27, %29 : vector<16x64xf32>
    %cst_14 = arith.constant 5.000000e-01 : f32
    %31 = vector.broadcast %cst_14 : f32 to vector<16x64xf32>
    %32 = arith.mulf %31, %30 : vector<16x64xf32>
    %cst_15 = arith.constant 0.707106769 : f32
    %33 = vector.broadcast %cst_15 : f32 to vector<16x64xf32>
    %34 = arith.mulf %30, %33 : vector<16x64xf32>
    %35 = math.absf %34 : vector<16x64xf32>
    %cst_16 = arith.constant 0.327591091 : f32
    %36 = vector.broadcast %cst_16 : f32 to vector<16x64xf32>
    %37 = arith.mulf %36, %35 : vector<16x64xf32>
    %cst_17 = arith.constant 1.000000e+00 : f32
    %38 = vector.broadcast %cst_17 : f32 to vector<16x64xf32>
    %39 = arith.addf %38, %37 : vector<16x64xf32>
    %40 = tpu.reciprocal %39 {approx = true} : vector<16x64xf32> -> vector<16x64xf32>
    %cst_18 = arith.constant 1.06140542 : f32
    %41 = vector.broadcast %cst_18 : f32 to vector<16x64xf32>
    %42 = arith.mulf %41, %40 : vector<16x64xf32>
    %cst_19 = arith.constant -1.45315206 : f32
    %43 = vector.broadcast %cst_19 : f32 to vector<16x64xf32>
    %44 = arith.addf %42, %43 : vector<16x64xf32>
    %45 = arith.mulf %44, %40 : vector<16x64xf32>
    %cst_20 = arith.constant 1.42141378 : f32
    %46 = vector.broadcast %cst_20 : f32 to vector<16x64xf32>
    %47 = arith.addf %45, %46 : vector<16x64xf32>
    %48 = arith.mulf %47, %40 : vector<16x64xf32>
    %cst_21 = arith.constant -0.284496725 : f32
    %49 = vector.broadcast %cst_21 : f32 to vector<16x64xf32>
    %50 = arith.addf %48, %49 : vector<16x64xf32>
    %51 = arith.mulf %50, %40 : vector<16x64xf32>
    %cst_22 = arith.constant 0.254829586 : f32
    %52 = vector.broadcast %cst_22 : f32 to vector<16x64xf32>
    %53 = arith.addf %51, %52 : vector<16x64xf32>
    %54 = arith.mulf %53, %40 : vector<16x64xf32>
    %cst_23 = arith.constant 0.000000e+00 : f32
    %55 = vector.broadcast %cst_23 : f32 to vector<16x64xf32>
    %56 = arith.subf %55, %35 : vector<16x64xf32>
    %57 = arith.mulf %56, %35 : vector<16x64xf32>
    %58 = math.exp %57 : vector<16x64xf32>
    %59 = arith.mulf %54, %58 : vector<16x64xf32>
    %cst_24 = arith.constant 1.000000e+00 : f32
    %60 = vector.broadcast %cst_24 : f32 to vector<16x64xf32>
    %61 = arith.subf %60, %59 : vector<16x64xf32>
    %cst_25 = arith.constant 0.000000e+00 : f32
    %62 = vector.broadcast %cst_25 : f32 to vector<16x64xf32>
    %63 = arith.cmpf oge, %34, %62 : vector<16x64xf32>
    %cst_26 = arith.constant 0.000000e+00 : f32
    %64 = vector.broadcast %cst_26 : f32 to vector<16x64xf32>
    %65 = arith.subf %64, %61 : vector<16x64xf32>
    %66 = arith.select %63, %61, %65 : vector<16x64xi1>, vector<16x64xf32>
    %cst_27 = arith.constant 1.000000e+00 : f32
    %67 = vector.broadcast %cst_27 : f32 to vector<16x64xf32>
    %68 = arith.addf %67, %66 : vector<16x64xf32>
    %69 = arith.mulf %32, %68 : vector<16x64xf32>
    %70 = arith.truncf %69 : vector<16x64xf32> to vector<16x64xbf16>
    %c0_28 = arith.constant 0 : index
    %c0_29 = arith.constant 0 : index
    %71 = vector.load %arg7[%c0_28, %c0_29] : memref<64x32xbf16, #tpu.memory_space<vmem>>, vector<64x32xbf16>
    %cst_30 = arith.constant dense<0.000000e+00> : vector<16x32xf32>
    %72 = tpu.matmul %70, %71, %cst_30 {dimension_numbers = #tpu.dot_dimension_numbers<[1], [0], [0], [1], [0, 0, 1, 1], [], []>} : vector<16x64xbf16>, vector<64x32xbf16>, vector<16x32xf32> -> vector<16x32xf32>
    %c0_31 = arith.constant 0 : index
    %c0_32 = arith.constant 0 : index
    %73 = vector.load %arg8[%c0_31, %c0_32] : memref<1x32xf32, #tpu.memory_space<vmem>>, vector<1x32xf32>
    %74 = vector.broadcast %73 : vector<1x32xf32> to vector<16x32xf32>
    %75 = arith.addf %72, %74 : vector<16x32xf32>
    %76 = arith.addf %0, %75 : vector<16x32xf32>
    %c0_33 = arith.constant 0 : index
    %c0_34 = arith.constant 0 : index
    %77 = vector.load %arg2[%c0_33, %c0_34] : memref<16x32xf32, #tpu.memory_space<vmem>>, vector<16x32xf32>
    %78 = arith.addf %76, %77 : vector<16x32xf32>
    %79 = arith.truncf %78 : vector<16x32xf32> to vector<16x32xbf16>
    %c0_35 = arith.constant 0 : index
    %c0_36 = arith.constant 0 : index
    %80 = vector.load %arg9[%c0_35, %c0_36] : memref<16x32xbf16, #tpu.memory_space<vmem>>, vector<16x32xbf16>
    tpu.vector_store %arg9[%c0_35, %c0_36], %79 {strides = array<i32>} : memref<16x32xbf16, #tpu.memory_space<vmem>>, vector<16x32xbf16>,
    return
  }
  func.func @transform_0(%arg0: i32) -> (i32, i32) {
    %c0_i32 = arith.constant 0 : i32
    %c0_i32_0 = arith.constant 0 : i32
    return %arg0, %c0_i32 : i32, i32
  }
  func.func @transform_1(%arg0: i32) -> (i32, i32) {
    %c0_i32 = arith.constant 0 : i32
    %c0_i32_0 = arith.constant 0 : i32
    return %arg0, %c0_i32 : i32, i32
  }
  func.func @transform_2(%arg0: i32) -> (i32, i32) {
    %c0_i32 = arith.constant 0 : i32
    %c0_i32_0 = arith.constant 0 : i32
    %c0_i32_1 = arith.constant 0 : i32
    return %c0_i32, %c0_i32_0 : i32, i32
  }
  func.func @transform_3(%arg0: i32) -> (i32, i32) {
    %c0_i32 = arith.constant 0 : i32
    %c0_i32_0 = arith.constant 0 : i32
    %c0_i32_1 = arith.constant 0 : i32
    return %c0_i32, %c0_i32_0 : i32, i32
  }
  func.func @transform_4(%arg0: i32) -> (i32, i32) {
    %c0_i32 = arith.constant 0 : i32
    %c0_i32_0 = arith.constant 0 : i32
    %c0_i32_1 = arith.constant 0 : i32
    return %c0_i32, %c0_i32_0 : i32, i32
  }
  func.func @transform_5(%arg0: i32) -> (i32, i32) {
    %c0_i32 = arith.constant 0 : i32
    %c0_i32_0 = arith.constant 0 : i32
    %c0_i32_1 = arith.constant 0 : i32
    return %c0_i32, %c0_i32_0 : i32, i32
  }
  func.func @transform_6(%arg0: i32) -> (i32, i32) {
    %c0_i32 = arith.constant 0 : i32
    %c0_i32_0 = arith.constant 0 : i32
    %c0_i32_1 = arith.constant 0 : i32
    return %c0_i32, %c0_i32_0 : i32, i32
  }
  func.func @transform_7(%arg0: i32) -> (i32, i32) {
    %c0_i32 = arith.constant 0 : i32
    %c0_i32_0 = arith.constant 0 : i32
    %c0_i32_1 = arith.constant 0 : i32
    return %c0_i32, %c0_i32_0 : i32, i32
  }
  func.func @transform_8(%arg0: i32) -> (i32, i32) {
    %c0_i32 = arith.constant 0 : i32
    %c0_i32_0 = arith.constant 0 : i32
    return %arg0, %c0_i32 : i32, i32
  }
}

module attributes {stable_mosaic.version = 11 : i64} {
  func.func @_matmul_kernel(%arg0: i32, %arg1: i32, %arg2: i32, %arg3: memref<32x32xbf16, #tpu.memory_space<vmem>>, %arg4: memref<32x32xbf16, #tpu.memory_space<vmem>>, %arg5: memref<1x32xf32, #tpu.memory_space<vmem>>, %arg6: memref<32x32xbf16, #tpu.memory_space<vmem>>, %arg7: memref<32x32xf32, #tpu.memory_space<vmem>>) attributes {dimension_semantics = [#tpu.dimension_semantics<parallel>, #tpu.dimension_semantics<parallel>, #tpu.dimension_semantics<arbitrary>], iteration_bounds = array<i64: 1, 1, 1>, scalar_prefetch = 0 : i64, scratch_operands = 1 : i64, tpu.core_type = #tpu.core_type<tc>, window_params = [{transform_indices = @transform_0, window_bounds = array<i64: 32, 32>}, {transform_indices = @transform_1, window_bounds = array<i64: 32, 32>}, {transform_indices = @transform_2, window_bounds = array<i64: 1, 32>}, {transform_indices = @transform_3, window_bounds = array<i64: 32, 32>}]} {
    %c0_i32 = arith.constant 0 : i32
    %0 = arith.cmpi eq, %arg2, %c0_i32 : i32
    %1 = arith.extui %0 : i1 to i32
    %c0_i32_0 = arith.constant 0 : i32
    %2 = arith.cmpi ne, %1, %c0_i32_0 : i32
    scf.if %2 {
      %cst_10 = arith.constant 0.000000e+00 : f32
      %12 = vector.broadcast %cst_10 : f32 to vector<32x32xf32>
      %c0_11 = arith.constant 0 : index
      %c0_12 = arith.constant 0 : index
      %13 = vector.load %arg7[%c0_11, %c0_12] : memref<32x32xf32, #tpu.memory_space<vmem>>, vector<32x32xf32>
      tpu.vector_store %arg7[%c0_11, %c0_12], %12 {strides = array<i32>} : memref<32x32xf32, #tpu.memory_space<vmem>>, vector<32x32xf32>,
    } else {
    }
    %c0 = arith.constant 0 : index
    %c0_1 = arith.constant 0 : index
    %3 = vector.load %arg7[%c0, %c0_1] : memref<32x32xf32, #tpu.memory_space<vmem>>, vector<32x32xf32>
    %c0_2 = arith.constant 0 : index
    %c0_3 = arith.constant 0 : index
    %4 = vector.load %arg3[%c0_2, %c0_3] : memref<32x32xbf16, #tpu.memory_space<vmem>>, vector<32x32xbf16>
    %c0_4 = arith.constant 0 : index
    %c0_5 = arith.constant 0 : index
    %5 = vector.load %arg4[%c0_4, %c0_5] : memref<32x32xbf16, #tpu.memory_space<vmem>>, vector<32x32xbf16>
    %cst = arith.constant dense<0.000000e+00> : vector<32x32xf32>
    %6 = tpu.matmul %4, %5, %cst {dimension_numbers = #tpu.dot_dimension_numbers<[1], [0], [0], [1], [0, 0, 1, 1], [], []>} : vector<32x32xbf16>, vector<32x32xbf16>, vector<32x32xf32> -> vector<32x32xf32>
    %7 = arith.addf %3, %6 : vector<32x32xf32>
    %c0_6 = arith.constant 0 : index
    %c0_7 = arith.constant 0 : index
    %8 = vector.load %arg7[%c0_6, %c0_7] : memref<32x32xf32, #tpu.memory_space<vmem>>, vector<32x32xf32>
    tpu.vector_store %arg7[%c0_6, %c0_7], %7 {strides = array<i32>} : memref<32x32xf32, #tpu.memory_space<vmem>>, vector<32x32xf32>,
    %c0_i32_8 = arith.constant 0 : i32
    %9 = arith.cmpi eq, %arg2, %c0_i32_8 : i32
    %10 = arith.extui %9 : i1 to i32
    %c0_i32_9 = arith.constant 0 : i32
    %11 = arith.cmpi ne, %10, %c0_i32_9 : i32
    scf.if %11 {
      %c0_10 = arith.constant 0 : index
      %c0_11 = arith.constant 0 : index
      %12 = vector.load %arg7[%c0_10, %c0_11] : memref<32x32xf32, #tpu.memory_space<vmem>>, vector<32x32xf32>
      %c0_12 = arith.constant 0 : index
      %c0_13 = arith.constant 0 : index
      %13 = vector.load %arg5[%c0_12, %c0_13] : memref<1x32xf32, #tpu.memory_space<vmem>>, vector<1x32xf32>
      %14 = vector.broadcast %13 : vector<1x32xf32> to vector<32x32xf32>
      %15 = arith.addf %12, %14 : vector<32x32xf32>
      %cst_14 = arith.constant 5.000000e-01 : f32
      %16 = vector.broadcast %cst_14 : f32 to vector<32x32xf32>
      %17 = arith.mulf %16, %15 : vector<32x32xf32>
      %cst_15 = arith.constant 0.707106769 : f32
      %18 = vector.broadcast %cst_15 : f32 to vector<32x32xf32>
      %19 = arith.mulf %15, %18 : vector<32x32xf32>
      %20 = math.absf %19 : vector<32x32xf32>
      %cst_16 = arith.constant 0.327591091 : f32
      %21 = vector.broadcast %cst_16 : f32 to vector<32x32xf32>
      %22 = arith.mulf %21, %20 : vector<32x32xf32>
      %cst_17 = arith.constant 1.000000e+00 : f32
      %23 = vector.broadcast %cst_17 : f32 to vector<32x32xf32>
      %24 = arith.addf %23, %22 : vector<32x32xf32>
      %25 = tpu.reciprocal %24 {approx = true} : vector<32x32xf32> -> vector<32x32xf32>
      %cst_18 = arith.constant 1.06140542 : f32
      %26 = vector.broadcast %cst_18 : f32 to vector<32x32xf32>
      %27 = arith.mulf %26, %25 : vector<32x32xf32>
      %cst_19 = arith.constant -1.45315206 : f32
      %28 = vector.broadcast %cst_19 : f32 to vector<32x32xf32>
      %29 = arith.addf %27, %28 : vector<32x32xf32>
      %30 = arith.mulf %29, %25 : vector<32x32xf32>
      %cst_20 = arith.constant 1.42141378 : f32
      %31 = vector.broadcast %cst_20 : f32 to vector<32x32xf32>
      %32 = arith.addf %30, %31 : vector<32x32xf32>
      %33 = arith.mulf %32, %25 : vector<32x32xf32>
      %cst_21 = arith.constant -0.284496725 : f32
      %34 = vector.broadcast %cst_21 : f32 to vector<32x32xf32>
      %35 = arith.addf %33, %34 : vector<32x32xf32>
      %36 = arith.mulf %35, %25 : vector<32x32xf32>
      %cst_22 = arith.constant 0.254829586 : f32
      %37 = vector.broadcast %cst_22 : f32 to vector<32x32xf32>
      %38 = arith.addf %36, %37 : vector<32x32xf32>
      %39 = arith.mulf %38, %25 : vector<32x32xf32>
      %cst_23 = arith.constant 0.000000e+00 : f32
      %40 = vector.broadcast %cst_23 : f32 to vector<32x32xf32>
      %41 = arith.subf %40, %20 : vector<32x32xf32>
      %42 = arith.mulf %41, %20 : vector<32x32xf32>
      %43 = math.exp %42 : vector<32x32xf32>
      %44 = arith.mulf %39, %43 : vector<32x32xf32>
      %cst_24 = arith.constant 1.000000e+00 : f32
      %45 = vector.broadcast %cst_24 : f32 to vector<32x32xf32>
      %46 = arith.subf %45, %44 : vector<32x32xf32>
      %cst_25 = arith.constant 0.000000e+00 : f32
      %47 = vector.broadcast %cst_25 : f32 to vector<32x32xf32>
      %48 = arith.cmpf oge, %19, %47 : vector<32x32xf32>
      %cst_26 = arith.constant 0.000000e+00 : f32
      %49 = vector.broadcast %cst_26 : f32 to vector<32x32xf32>
      %50 = arith.subf %49, %46 : vector<32x32xf32>
      %51 = arith.select %48, %46, %50 : vector<32x32xi1>, vector<32x32xf32>
      %cst_27 = arith.constant 1.000000e+00 : f32
      %52 = vector.broadcast %cst_27 : f32 to vector<32x32xf32>
      %53 = arith.addf %52, %51 : vector<32x32xf32>
      %54 = arith.mulf %17, %53 : vector<32x32xf32>
      %55 = arith.truncf %54 : vector<32x32xf32> to vector<32x32xbf16>
      %c0_28 = arith.constant 0 : index
      %c0_29 = arith.constant 0 : index
      %56 = vector.load %arg6[%c0_28, %c0_29] : memref<32x32xbf16, #tpu.memory_space<vmem>>, vector<32x32xbf16>
      tpu.vector_store %arg6[%c0_28, %c0_29], %55 {strides = array<i32>} : memref<32x32xbf16, #tpu.memory_space<vmem>>, vector<32x32xbf16>,
    } else {
    }
    return
  }
  func.func @transform_0(%arg0: i32, %arg1: i32, %arg2: i32) -> (i32, i32) {
    %c0_i32 = arith.constant 0 : i32
    return %arg0, %arg2 : i32, i32
  }
  func.func @transform_1(%arg0: i32, %arg1: i32, %arg2: i32) -> (i32, i32) {
    %c0_i32 = arith.constant 0 : i32
    return %arg2, %arg1 : i32, i32
  }
  func.func @transform_2(%arg0: i32, %arg1: i32, %arg2: i32) -> (i32, i32) {
    %c0_i32 = arith.constant 0 : i32
    %c0_i32_0 = arith.constant 0 : i32
    return %c0_i32, %arg1 : i32, i32
  }
  func.func @transform_3(%arg0: i32, %arg1: i32, %arg2: i32) -> (i32, i32) {
    %c0_i32 = arith.constant 0 : i32
    return %arg0, %arg1 : i32, i32
  }
}

module attributes {stable_mosaic.version = 11 : i64} {
  func.func @_matmul_kernel(%arg0: i32, %arg1: i32, %arg2: i32, %arg3: memref<16x512xbf16, #tpu.memory_space<vmem>>, %arg4: memref<512x384xbf16, #tpu.memory_space<vmem>>, %arg5: memref<1x384xf32, #tpu.memory_space<vmem>>, %arg6: memref<16x384xf32, #tpu.memory_space<vmem>>, %arg7: memref<16x384xf32, #tpu.memory_space<vmem>>) attributes {dimension_semantics = [#tpu.dimension_semantics<parallel>, #tpu.dimension_semantics<parallel>, #tpu.dimension_semantics<arbitrary>], iteration_bounds = array<i64: 1, 2, 1>, scalar_prefetch = 0 : i64, scratch_operands = 1 : i64, tpu.core_type = #tpu.core_type<tc>, window_params = [{transform_indices = @transform_0, window_bounds = array<i64: 16, 512>}, {transform_indices = @transform_1, window_bounds = array<i64: 512, 384>}, {transform_indices = @transform_2, window_bounds = array<i64: 1, 384>}, {transform_indices = @transform_3, window_bounds = array<i64: 16, 384>}]} {
    %c0_i32 = arith.constant 0 : i32
    %0 = arith.cmpi eq, %arg2, %c0_i32 : i32
    %1 = arith.extui %0 : i1 to i32
    %c0_i32_0 = arith.constant 0 : i32
    %2 = arith.cmpi ne, %1, %c0_i32_0 : i32
    scf.if %2 {
      %cst_10 = arith.constant 0.000000e+00 : f32
      %12 = vector.broadcast %cst_10 : f32 to vector<16x384xf32>
      %c0_11 = arith.constant 0 : index
      %c0_12 = arith.constant 0 : index
      %13 = vector.load %arg7[%c0_11, %c0_12] : memref<16x384xf32, #tpu.memory_space<vmem>>, vector<16x384xf32>
      tpu.vector_store %arg7[%c0_11, %c0_12], %12 {strides = array<i32>} : memref<16x384xf32, #tpu.memory_space<vmem>>, vector<16x384xf32>,
    } else {
    }
    %c0 = arith.constant 0 : index
    %c0_1 = arith.constant 0 : index
    %3 = vector.load %arg7[%c0, %c0_1] : memref<16x384xf32, #tpu.memory_space<vmem>>, vector<16x384xf32>
    %c0_2 = arith.constant 0 : index
    %c0_3 = arith.constant 0 : index
    %4 = vector.load %arg3[%c0_2, %c0_3] : memref<16x512xbf16, #tpu.memory_space<vmem>>, vector<16x512xbf16>
    %c0_4 = arith.constant 0 : index
    %c0_5 = arith.constant 0 : index
    %5 = vector.load %arg4[%c0_4, %c0_5] : memref<512x384xbf16, #tpu.memory_space<vmem>>, vector<512x384xbf16>
    %cst = arith.constant dense<0.000000e+00> : vector<16x384xf32>
    %6 = tpu.matmul %4, %5, %cst {dimension_numbers = #tpu.dot_dimension_numbers<[1], [0], [0], [1], [0, 0, 1, 1], [], []>} : vector<16x512xbf16>, vector<512x384xbf16>, vector<16x384xf32> -> vector<16x384xf32>
    %7 = arith.addf %3, %6 : vector<16x384xf32>
    %c0_6 = arith.constant 0 : index
    %c0_7 = arith.constant 0 : index
    %8 = vector.load %arg7[%c0_6, %c0_7] : memref<16x384xf32, #tpu.memory_space<vmem>>, vector<16x384xf32>
    tpu.vector_store %arg7[%c0_6, %c0_7], %7 {strides = array<i32>} : memref<16x384xf32, #tpu.memory_space<vmem>>, vector<16x384xf32>,
    %c0_i32_8 = arith.constant 0 : i32
    %9 = arith.cmpi eq, %arg2, %c0_i32_8 : i32
    %10 = arith.extui %9 : i1 to i32
    %c0_i32_9 = arith.constant 0 : i32
    %11 = arith.cmpi ne, %10, %c0_i32_9 : i32
    scf.if %11 {
      %c0_10 = arith.constant 0 : index
      %c0_11 = arith.constant 0 : index
      %12 = vector.load %arg7[%c0_10, %c0_11] : memref<16x384xf32, #tpu.memory_space<vmem>>, vector<16x384xf32>
      %c0_12 = arith.constant 0 : index
      %c0_13 = arith.constant 0 : index
      %13 = vector.load %arg5[%c0_12, %c0_13] : memref<1x384xf32, #tpu.memory_space<vmem>>, vector<1x384xf32>
      %14 = vector.broadcast %13 : vector<1x384xf32> to vector<16x384xf32>
      %15 = arith.addf %12, %14 : vector<16x384xf32>
      %16 = arith.negf %15 : vector<16x384xf32>
      %17 = math.exp %16 : vector<16x384xf32>
      %cst_14 = arith.constant 1.000000e+00 : f32
      %18 = vector.broadcast %cst_14 : f32 to vector<16x384xf32>
      %19 = arith.addf %18, %17 : vector<16x384xf32>
      %20 = arith.divf %18, %19 : vector<16x384xf32>
      %c0_15 = arith.constant 0 : index
      %c0_16 = arith.constant 0 : index
      %21 = vector.load %arg6[%c0_15, %c0_16] : memref<16x384xf32, #tpu.memory_space<vmem>>, vector<16x384xf32>
      tpu.vector_store %arg6[%c0_15, %c0_16], %20 {strides = array<i32>} : memref<16x384xf32, #tpu.memory_space<vmem>>, vector<16x384xf32>,
    } else {
    }
    return
  }
  func.func @transform_0(%arg0: i32, %arg1: i32, %arg2: i32) -> (i32, i32) {
    %c0_i32 = arith.constant 0 : i32
    return %arg0, %arg2 : i32, i32
  }
  func.func @transform_1(%arg0: i32, %arg1: i32, %arg2: i32) -> (i32, i32) {
    %c0_i32 = arith.constant 0 : i32
    return %arg2, %arg1 : i32, i32
  }
  func.func @transform_2(%arg0: i32, %arg1: i32, %arg2: i32) -> (i32, i32) {
    %c0_i32 = arith.constant 0 : i32
    %c0_i32_0 = arith.constant 0 : i32
    return %c0_i32, %arg1 : i32, i32
  }
  func.func @transform_3(%arg0: i32, %arg1: i32, %arg2: i32) -> (i32, i32) {
    %c0_i32 = arith.constant 0 : i32
    return %arg0, %arg1 : i32, i32
  }
}

module attributes {stable_mosaic.version = 11 : i64} {
  func.func @_loss_kernel(%arg0: i32, %arg1: memref<16x48xf32, #tpu.memory_space<vmem>>, %arg2: memref<16x48xf32, #tpu.memory_space<vmem>>, %arg3: memref<2xf32, #tpu.memory_space<smem>>, %arg4: memref<16x48xf32, #tpu.memory_space<vmem>>, %arg5: memref<16x48xf32, #tpu.memory_space<vmem>>) attributes {dimension_semantics = [#tpu.dimension_semantics<arbitrary>], iteration_bounds = array<i64: 1>, scalar_prefetch = 0 : i64, scratch_operands = 2 : i64, tpu.core_type = #tpu.core_type<tc>, window_params = [{transform_indices = @transform_0, window_bounds = array<i64: 16, 48>}, {transform_indices = @transform_1, window_bounds = array<i64: 16, 48>}, {transform_indices = @transform_2, window_bounds = array<i64: 2>}]} {
    %c0_i32 = arith.constant 0 : i32
    %0 = arith.cmpi eq, %arg0, %c0_i32 : i32
    %1 = arith.extui %0 : i1 to i32
    %c0_i32_0 = arith.constant 0 : i32
    %2 = arith.cmpi ne, %1, %c0_i32_0 : i32
    scf.if %2 {
      %cst = arith.constant 0.000000e+00 : f32
      %17 = vector.broadcast %cst : f32 to vector<16x48xf32>
      %c0_14 = arith.constant 0 : index
      %c0_15 = arith.constant 0 : index
      %18 = vector.load %arg4[%c0_14, %c0_15] : memref<16x48xf32, #tpu.memory_space<vmem>>, vector<16x48xf32>
      tpu.vector_store %arg4[%c0_14, %c0_15], %17 {strides = array<i32>} : memref<16x48xf32, #tpu.memory_space<vmem>>, vector<16x48xf32>,
      %cst_16 = arith.constant 0.000000e+00 : f32
      %19 = vector.broadcast %cst_16 : f32 to vector<16x48xf32>
      %c0_17 = arith.constant 0 : index
      %c0_18 = arith.constant 0 : index
      %20 = vector.load %arg5[%c0_17, %c0_18] : memref<16x48xf32, #tpu.memory_space<vmem>>, vector<16x48xf32>
      tpu.vector_store %arg5[%c0_17, %c0_18], %19 {strides = array<i32>} : memref<16x48xf32, #tpu.memory_space<vmem>>, vector<16x48xf32>,
    } else {
    }
    %c0 = arith.constant 0 : index
    %c0_1 = arith.constant 0 : index
    %3 = vector.load %arg1[%c0, %c0_1] : memref<16x48xf32, #tpu.memory_space<vmem>>, vector<16x48xf32>
    %c0_2 = arith.constant 0 : index
    %c0_3 = arith.constant 0 : index
    %4 = vector.load %arg2[%c0_2, %c0_3] : memref<16x48xf32, #tpu.memory_space<vmem>>, vector<16x48xf32>
    %5 = arith.subf %3, %4 : vector<16x48xf32>
    %c0_4 = arith.constant 0 : index
    %c0_5 = arith.constant 0 : index
    %6 = vector.load %arg4[%c0_4, %c0_5] : memref<16x48xf32, #tpu.memory_space<vmem>>, vector<16x48xf32>
    %7 = arith.mulf %5, %5 : vector<16x48xf32>
    %8 = arith.addf %6, %7 : vector<16x48xf32>
    %c0_6 = arith.constant 0 : index
    %c0_7 = arith.constant 0 : index
    %9 = vector.load %arg4[%c0_6, %c0_7] : memref<16x48xf32, #tpu.memory_space<vmem>>, vector<16x48xf32>
    tpu.vector_store %arg4[%c0_6, %c0_7], %8 {strides = array<i32>} : memref<16x48xf32, #tpu.memory_space<vmem>>, vector<16x48xf32>,
    %c0_8 = arith.constant 0 : index
    %c0_9 = arith.constant 0 : index
    %10 = vector.load %arg5[%c0_8, %c0_9] : memref<16x48xf32, #tpu.memory_space<vmem>>, vector<16x48xf32>
    %11 = math.absf %5 : vector<16x48xf32>
    %12 = arith.addf %10, %11 : vector<16x48xf32>
    %c0_10 = arith.constant 0 : index
    %c0_11 = arith.constant 0 : index
    %13 = vector.load %arg5[%c0_10, %c0_11] : memref<16x48xf32, #tpu.memory_space<vmem>>, vector<16x48xf32>
    tpu.vector_store %arg5[%c0_10, %c0_11], %12 {strides = array<i32>} : memref<16x48xf32, #tpu.memory_space<vmem>>, vector<16x48xf32>,
    %c0_i32_12 = arith.constant 0 : i32
    %14 = arith.cmpi eq, %arg0, %c0_i32_12 : i32
    %15 = arith.extui %14 : i1 to i32
    %c0_i32_13 = arith.constant 0 : i32
    %16 = arith.cmpi ne, %15, %c0_i32_13 : i32
    scf.if %16 {
      %c0_14 = arith.constant 0 : index
      %c0_15 = arith.constant 0 : index
      %17 = vector.load %arg4[%c0_14, %c0_15] : memref<16x48xf32, #tpu.memory_space<vmem>>, vector<16x48xf32>
      %18 = vector.shape_cast %17 : vector<16x48xf32> to vector<1x16x48xf32>
      %cst = arith.constant dense<0.000000e+00> : vector<1xf32>
      %19 = vector.multi_reduction <add>, %18, %cst [1, 2] : vector<1x16x48xf32> to vector<1xf32>
      %20 = vector.shape_cast %19 : vector<1xf32> to vector<1x1x1xf32>
      %21 = vector.extract %20[0, 0, 0] : f32 from vector<1x1x1xf32>
      %c0_16 = arith.constant 0 : index
      %22 = memref.load %arg3[%c0_16] : memref<2xf32, #tpu.memory_space<smem>>
      memref.store %21, %arg3[%c0_16] : memref<2xf32, #tpu.memory_space<smem>>
      %c0_17 = arith.constant 0 : index
      %c0_18 = arith.constant 0 : index
      %23 = vector.load %arg5[%c0_17, %c0_18] : memref<16x48xf32, #tpu.memory_space<vmem>>, vector<16x48xf32>
      %24 = vector.shape_cast %23 : vector<16x48xf32> to vector<1x16x48xf32>
      %cst_19 = arith.constant dense<0.000000e+00> : vector<1xf32>
      %25 = vector.multi_reduction <add>, %24, %cst_19 [1, 2] : vector<1x16x48xf32> to vector<1xf32>
      %26 = vector.shape_cast %25 : vector<1xf32> to vector<1x1x1xf32>
      %27 = vector.extract %26[0, 0, 0] : f32 from vector<1x1x1xf32>
      %c1 = arith.constant 1 : index
      %28 = memref.load %arg3[%c1] : memref<2xf32, #tpu.memory_space<smem>>
      memref.store %27, %arg3[%c1] : memref<2xf32, #tpu.memory_space<smem>>
    } else {
    }
    return
  }
  func.func @transform_0(%arg0: i32) -> (i32, i32) {
    %c0_i32 = arith.constant 0 : i32
    %c0_i32_0 = arith.constant 0 : i32
    return %arg0, %c0_i32 : i32, i32
  }
  func.func @transform_1(%arg0: i32) -> (i32, i32) {
    %c0_i32 = arith.constant 0 : i32
    %c0_i32_0 = arith.constant 0 : i32
    return %arg0, %c0_i32 : i32, i32
  }
  func.func @transform_2(%arg0: i32) -> i32 {
    %c0_i32 = arith.constant 0 : i32
    %c0_i32_0 = arith.constant 0 : i32
    return %c0_i32 : i32
  }
}

</mosaic_0001>

<bundles_post_ra>
// kernel: _lambda_.5
= control target key start
LH: loop header
LB: loop body
LE: loop exit
PB: predicated region body
PF: predicated region fallthrough
CT: control target
= control target key end

     0   :  { %vm19_vm0 = vcmask 261120   ;;  %v219_v0 = vmov 0.0   ;;  %vm220_vm1 = vmmov 0   ;;  %vm65_vm2 = vcmask 392192   ;;  %s310_s1 = inlined_call_operand.vmem [shape: bf16[48,32], index: 1, kind: input, shape index: {}]   ;;  %s311_s0 = inlined_call_operand.vmem [shape: f32[48,48], index: 0, kind: input, shape index: {}]   ;;  %s312_s2 = inlined_call_operand.vmem [shape: f32[1,32], index: 2, kind: input, shape index: {}]   ;;  %s313_s3 = inlined_call_operand.vmem [shape: f32[48,32], index: 3, kind: output, shape index: {}]  }
   0x1   :  { %208 = vmatprep.subr.bf16.mxu1 %v219_v0  ;;  %v216_v1 = vld [vmem:[%s310_s1 + $0x10] sm:$0xff]   ;;  %190 = vmatprep.subr.bf16.mxu0 %v219_v0  ;;  %22 = vst.msk [vmem:[#allocation2 + $0x10] sm:$0xff] %vm19_vm0, %v219_v0  ;;  %20 = vst.msk [vmem:[#allocation2] sm:$0xff] %vm19_vm0, %v219_v0  ;;  %v217_v2 = vld [vmem:[%s310_s1 + $0x8] sm:$0xff]  }
   0x2   :  { %21 = vst.msk [vmem:[#allocation2 + $0x8] sm:$0xff] %vm19_vm0, %v219_v0  ;;  %23 = vst.msk [vmem:[#allocation2 + $0x18] sm:$0xff] %vm19_vm0, %v219_v0  ;;  %200 = vmatprep.mubr.msk.bf16.mxu1 %vm220_vm1, %v219_v0  ;;  %196 = vmatprep.mubr.msk.bf16.mxu0 %vm220_vm1, %v219_v0  ;;  %v218_v3 = vld [vmem:[%s310_s1] sm:$0xff]   ;;  %v34_v4 = vld [vmem:[%s311_s0 + $0x10] sm:$0xff] }
   0x3   :  { %24 = vst.msk [vmem:[#allocation2 + $0x20] sm:$0xff] %vm19_vm0, %v219_v0  ;;  %25 = vst.msk [vmem:[#allocation2 + $0x28] sm:$0xff] %vm19_vm0, %v219_v0  ;;  %211 = vmatpush3.bf16.msra.mxu1 %v216_v1  ;;  %191 = vmatpush3.bf16.msra.mxu0 %v216_v1  ;;  %v35_v5 = vld [vmem:[%s311_s0 + $0x18] sm:$0xff]  ;;  %v32_v6 = vld [vmem:[%s311_s0] sm:$0xff] }
   0x4   :  { %209 = vmatprep.subr.bf16.mxu1 %v219_v0  ;;  %192 = vmatprep.subr.bf16.mxu0 %v219_v0  ;;  %v33_v7 = vld [vmem:[%s311_s0 + $0x8] sm:$0xff]  ;;  %v39_v8 = vpack.c.bf16 %v35_v5, %v34_v4  ;;  %v36_v10 = vld [vmem:[%s311_s0 + $0x20] sm:$0xff] }
   0x5   :  { %v38_v9 = vpack.c.bf16 %v33_v7, %v32_v6  ;;  %v37_v11 = vld [vmem:[%s311_s0 + $0x28] sm:$0xff]  ;;  %v183_v30 = vld [vmem:[%s312_s2] ss:$0 sm:$0xff] }
   0x6   :  { %v40_v12 = vpack.c.bf16 %v37_v11, %v36_v10 }
   0x7   :  { %212 = vmatpush3.bf16.msra.mxu1 %v217_v2  ;;  %193 = vmatpush3.bf16.msra.mxu0 %v217_v2 }
   0x8   :  { %210 = vmatprep.subr.bf16.mxu1 %v219_v0  ;;  %194 = vmatprep.subr.bf16.mxu0 %v219_v0  ;;  %v28_v13 = vld [vmem:[#allocation2 + $0x10] sm:$0xff]  ;;  %v26_v14 = vld [vmem:[#allocation2] sm:$0xff] }
   0x9   :  { %v29_v21 = vld [vmem:[#allocation2 + $0x18] sm:$0xff]  ;;  %v27_v22 = vld [vmem:[#allocation2 + $0x8] sm:$0xff] }
   0xa   :  { %v30_v29 = vld [vmem:[#allocation2 + $0x20] sm:$0xff]  ;;  %v31_v36 = vld [vmem:[#allocation2 + $0x28] sm:$0xff] }
   0xb   :  { %213 = vmatpush3.bf16.msra.mxu1 %v218_v3  ;;  %195 = vmatpush3.bf16.msra.mxu0 %v218_v3 }
   0xe   :  { %201 = vmatmul.mubr.msk.bf16.vlgmr.msra.gmra.mxu1 %vm65_vm2, %v39_v8  ;;  %197 = vmatmul.mubr.msk.bf16.vlgmr.msra.gmra.mxu0 %vm65_vm2, %v38_v9 }
   0xf   :  { %204 = vmatprep.mubr.msk.bf16.mxu1 %vm220_vm1, %v219_v0 }
  0x16   :  { %205 = vmatmul.mubr.msk.bf16.gmra.mxu1 %vm65_vm2, %v40_v12 }
  0xce   :  { %v117_v15 = vpop.f32.mrf.mxu1  ;;  %v109_v16 = vpop.f32.mrf.mxu0 }
  0xcf   :  { %v134_v17 = vadd.f32 %v117_v15, %v28_v13  ;;  %v132_v18 = vadd.f32 %v109_v16, %v26_v14 }
  0xd0   :  { %v202_v19 = vpop.f32.mrf.mxu1  ;;  %v198_v20 = vpop.f32.mrf.mxu0 }
  0xd1   :  { %141 = vst.msk [vmem:[#allocation2 + $0x10] sm:$0xff] %vm19_vm0, %v134_v17  ;;  %139 = vst.msk [vmem:[#allocation2] sm:$0xff] %vm19_vm0, %v132_v18 }
  0xd2   :  { %v120_v23 = vpop.f32.mrf.mxu1  ;;  %v112_v24 = vpop.f32.mrf.mxu0 }
  0xd3   :  { %v135_v25 = vadd.f32 %v120_v23, %v29_v21  ;;  %v133_v26 = vadd.f32 %v112_v24, %v27_v22 }
  0xd4   :  { %v203_v27 = vpop.f32.mrf.mxu1  ;;  %v199_v28 = vpop.f32.mrf.mxu0 }
  0xd5   :  { %142 = vst.msk [vmem:[#allocation2 + $0x18] sm:$0xff] %vm19_vm0, %v135_v25  ;;  %140 = vst.msk [vmem:[#allocation2 + $0x8] sm:$0xff] %vm19_vm0, %v133_v26 }
  0xd6   :  { %v125_v31 = vpop.f32.mrf.mxu1 }
  0xd7   :  { %v136_v32 = vadd.f32 %v125_v31, %v30_v29 }
  0xd8   :  { %v150_v33 = vld [vmem:[#allocation2 + $0x10] sm:$0xff]  ;;  %v148_v34 = vld [vmem:[#allocation2] sm:$0xff]  ;;  %v206_v35 = vpop.f32.mrf.mxu1 }
  0xd9   :  { %v163_v37 = vadd.f32 %v183_v30, %v150_v33  ;;  %v161_v38 = vadd.f32 %v183_v30, %v148_v34  ;;  %143 = vst.msk [vmem:[#allocation2 + $0x20] sm:$0xff] %vm19_vm0, %v136_v32 }
  0xda   :  { %v128_v39 = vpop.f32.mrf.mxu1 }
  0xdb   :  { %169 = vst.msk [vmem:[%s313_s3 + $0x10] sm:$0xff] %vm19_vm0, %v163_v37  ;;  %167 = vst.msk [vmem:[%s313_s3] sm:$0xff] %vm19_vm0, %v161_v38  ;;  %v137_v40 = vadd.f32 %v128_v39, %v31_v36 }
  0xdc   :  { %v151_v41 = vld [vmem:[#allocation2 + $0x18] sm:$0xff]  ;;  %v149_v42 = vld [vmem:[#allocation2 + $0x8] sm:$0xff]  ;;  %v207_v43 = vpop.f32.mrf.mxu1 }
  0xdd   :  { %v164_v44 = vadd.f32 %v183_v30, %v151_v41  ;;  %v162_v45 = vadd.f32 %v183_v30, %v149_v42  ;;  %144 = vst.msk [vmem:[#allocation2 + $0x28] sm:$0xff] %vm19_vm0, %v137_v40 }
  0xdf   :  { %170 = vst.msk [vmem:[%s313_s3 + $0x18] sm:$0xff] %vm19_vm0, %v164_v44  ;;  %168 = vst.msk [vmem:[%s313_s3 + $0x8] sm:$0xff] %vm19_vm0, %v162_v45 }
  0xe0   :  { %v152_v46 = vld [vmem:[#allocation2 + $0x20] sm:$0xff] }
  0xe1   :  { %v165_v47 = vadd.f32 %v183_v30, %v152_v46 }
  0xe3   :  { %171 = vst.msk [vmem:[%s313_s3 + $0x20] sm:$0xff] %vm19_vm0, %v165_v47 }
  0xe4   :  { %v153_v48 = vld [vmem:[#allocation2 + $0x28] sm:$0xff] }
  0xe5   :  { %v166_v49 = vadd.f32 %v183_v30, %v153_v48 }
  0xe7   :  { %172 = vst.msk [vmem:[%s313_s3 + $0x28] sm:$0xff] %vm19_vm0, %v166_v49 }

// kernel: _lambda_.6
= control target key start
LH: loop header
LB: loop body
LE: loop exit
PB: predicated region body
PF: predicated region fallthrough
CT: control target
= control target key end

     0   :  { %vm32_vm0 = vcmask 261120   ;;  %v368_v14 = vmov 0.0   ;;  %vm369_vm1 = vmmov 0   ;;  %vm238_vm4 = vcmask 523264   ;;  %s478_s0 = inlined_call_operand.vmem [shape: f32[16,32], index: 0, kind: input, shape index: {}]   ;;  %s479_s4 = inlined_call_operand.vmem [shape: bf16[32,64], index: 4, kind: input, shape index: {}]   ;;  %s480_s2 = inlined_call_operand.vmem [shape: f32[1,32], index: 2, kind: input, shape index: {}]   ;;  %s481_s3 = inlined_call_operand.vmem [shape: f32[1,32], index: 3, kind: input, shape index: {}]   ;;  %s482_s6 = inlined_call_operand.vmem [shape: bf16[64,32], index: 6, kind: input, shape index: {}]   ;;  %s483_s5 = inlined_call_operand.vmem [shape: f32[1,64], index: 5, kind: input, shape index: {}]   ;;  %s484_s7 = inlined_call_operand.vmem [shape: f32[1,32], index: 7, kind: input, shape index: {}]   ;;  %s485_s1 = inlined_call_operand.vmem [shape: f32[16,32], index: 1, kind: input, shape index: {}]   ;;  %s486_s8 = inlined_call_operand.vmem [shape: bf16[16,32], index: 8, kind: output, shape index: {}]  }
   0x1   :  { %v418_v0 = vld [vmem:[%s478_s0] sm:$0xff]  ;;  %v423_v1 = vld [vmem:[%s478_s0 + $0x8] sm:$0xff]  ;;  %328 = vmatprep.subr.bf16.mxu0 %v368_v14  ;;  %332 = vmatprep.mubr.msk.bf16.mxu0 %vm369_vm1, %v368_v14  ;;  %v352_v34 = vld [vmem:[%s482_s6 + $0x18] sm:$0xff]   ;;  %vm297_vm5 = vcmask 257024  }
   0x2   :  { %v33_v2 = vsel %vm32_vm0, %v418_v0, 0.0  ;;  %v36_v3 = vsel %vm32_vm0, %v423_v1, 0.0  ;;  %v350_v15 = vld [vmem:[%s479_s4 + $0x8] sm:$0xff]   ;;  %336 = vmatprep.subr.bf16.mxu1 %v368_v14  ;;  %344 = vmatprep.mubr.msk.bf16.mxu1 %vm369_vm1, %v368_v14  ;;  %v351_v16 = vld [vmem:[%s479_s4] sm:$0xff]   ;;  %v353_v35 = vld [vmem:[%s482_s6 + $0x10] sm:$0xff]  }
   0x3   :  { %34 = vadd.xlane.f32.xlu0 %v33_v2  ;;  %329 = vmatpush3.bf16.msra.mxu0 %v350_v15  ;;  %v304_v25 = vld [vmem:[%s480_s2] ss:$0 sm:$0xff]  ;;  %v354_v36 = vld [vmem:[%s482_s6 + $0x8] sm:$0xff]  }
   0x4   :  { %330 = vmatprep.subr.bf16.mxu0 %v368_v14  ;;  %v305_v29 = vld [vmem:[%s481_s3] ss:$0 sm:$0xff]  ;;  %337 = vmatpush3.bf16.msra.mxu1 %v352_v34 }
   0x5   :  { %338 = vmatprep.subr.bf16.mxu1 %v368_v14  ;;  %v355_v37 = vld [vmem:[%s482_s6] sm:$0xff]  }
   0x6   :  { %v306_v38 = vld [vmem:[%s483_s5] ss:$0 sm:$0xff] }
   0x7   :  { %37 = vadd.xlane.f32.xlu0 %v36_v3  ;;  %331 = vmatpush3.bf16.msra.mxu0 %v351_v16  ;;  %v310_v34 = vld [vmem:[%s484_s7] ss:$0 sm:$0xff] }
   0x8   :  { %339 = vmatpush3.bf16.msra.mxu1 %v353_v35 }
   0x9   :  { %340 = vmatprep.subr.bf16.mxu1 %v368_v14 }
   0xc   :  { %341 = vmatpush3.bf16.msra.mxu1 %v354_v36 }
   0xd   :  { %342 = vmatprep.subr.bf16.mxu1 %v368_v14 }
  0x10   :  { %343 = vmatpush3.bf16.msra.mxu1 %v355_v37  ;;  %v285_v37 = vld [vmem:[%s485_s1] sm:$0xff] }
  0x8c   :  { %v35_v4 = vpop.xlane.xlu0 %34 }
  0x8d   :  { %v40_v5 = vmul.f32 0.03125, %v35_v4 }
  0x8f   :  { %v42_v6 = vsub.f32 %v418_v0, %v40_v5 }
  0x90   :  { %v38_v7 = vpop.xlane.xlu0 %37 }
  0x91   :  { %v41_v8 = vmul.f32 0.03125, %v38_v7  ;;  %v44_v9 = vmul.f32 %v42_v6, %v42_v6 }
  0x93   :  { %v43_v10 = vsub.f32 %v423_v1, %v41_v8  ;;  %v46_v11 = vsel %vm32_vm0, %v44_v9, 0.0 }
  0x94   :  { %47 = vadd.xlane.f32.xlu1 %v46_v11 }
  0x95   :  { %v45_v12 = vmul.f32 %v43_v10, %v43_v10 }
  0x97   :  { %v49_v13 = vsel %vm32_vm0, %v45_v12, 0.0 }
  0x98   :  { %50 = vadd.xlane.f32.xlu1 %v49_v13 }
 0x11d   :  { %v48_v17 = vpop.xlane.xlu1 %47 }
 0x11e   :  { %v52_v18 = vmul.f32 0.03125, %v48_v17 }
 0x120   :  { %v54_v19 = vadd.f32 1e-05, %v52_v18 }
 0x121   :  { %v51_v20 = vpop.xlane.xlu1 %50 }
 0x122   :  { %356 = vrsqrt.f32 %v54_v19  ;;  %v53_v21 = vmul.f32 0.03125, %v51_v20 }
 0x124   :  { %v55_v22 = vadd.f32 1e-05, %v53_v21 }
 0x126   :  { %358 = vrsqrt.f32 %v55_v22 }
 0x12f   :  { %v357_v23 = vpop.eup %356 }
 0x130   :  { %v58_v24 = vmul.f32 %v357_v23, %v42_v6 }
 0x132   :  { %v67_v28 = vmul.f32 %v304_v25, %v58_v24 }
 0x133   :  { %v359_v26 = vpop.eup %358 }
 0x134   :  { %v59_v27 = vmul.f32 %v359_v26, %v43_v10  ;;  %v76_v31 = vadd.f32 %v305_v29, %v67_v28 }
 0x136   :  { %v68_v30 = vmul.f32 %v304_v25, %v59_v27 }
 0x138   :  { %v77_v32 = vadd.f32 %v305_v29, %v68_v30 }
 0x13a   :  { %v78_v33 = vpack.c.bf16 %v77_v32, %v76_v31 }
 0x13c   :  { %333 = vmatmul.mubr.msk.bf16.vlgmr.msra.gmra.mxu0 %vm32_vm0, %v78_v33 }
 0x1fc   :  { %v139_v39 = vpop.f32.mrf.mxu0 }
 0x1fd   :  { %v140_v40 = vadd.f32 %v306_v38, %v139_v39 }
 0x1fe   :  { %v334_v41 = vpop.f32.mrf.mxu0 }
 0x1ff   :  { %v148_v42 = vmul.f32 0.70710677, %v140_v40  ;;  %v146_v28 = vmul.f32 0.5, %v140_v40 }
 0x200   :  { %v142_v43 = vpop.f32.mrf.mxu0 }
 0x201   :  { %v150_v44 = vand.u32 2147483647, %v148_v42  ;;  %v143_v45 = vadd.f32 %v306_v38, %v142_v43  ;;  %vm188_vm2 = vcmp.ge.f32.partialorder %v148_v42, 0.0  ;;  %v286_v43 = vld [vmem:[%s485_s1 + $0x8] sm:$0xff] }
 0x202   :  { %v335_v46 = vpop.f32.mrf.mxu0 }
 0x203   :  { %v152_v47 = vmul.f32 0.3275911, %v150_v44  ;;  %v149_v48 = vmul.f32 0.70710677, %v143_v45  ;;  %v176_v53 = vsub.f32 0.0, %v150_v44  ;;  %v147_v29 = vmul.f32 0.5, %v143_v45 }
 0x205   :  { %v154_v49 = vadd.f32 1.0, %v152_v47  ;;  %v151_v50 = vand.u32 2147483647, %v149_v48  ;;  %v178_v54 = vmul.f32 %v176_v53, %v150_v44  ;;  %vm189_vm3 = vcmp.ge.f32.partialorder %v149_v48, 0.0 }
 0x207   :  { %360 = vrcp.f32 %v154_v49  ;;  %v153_v51 = vmul.f32 0.3275911, %v151_v50  ;;  %v177_v55 = vsub.f32 0.0, %v151_v50  ;;  %v180_v58 = vmul.f32 1.442695, %v178_v54 }
 0x209   :  { %v155_v52 = vadd.f32 1.0, %v153_v51  ;;  %v179_v59 = vmul.f32 %v177_v55, %v151_v50 }
 0x20b   :  { %362 = vrcp.f32 %v155_v52  ;;  %v182_v2 = vmul.f32 1.442695, %v179_v59 }
 0x20c   :  { %364 = vpow2.f32 %v180_v58 }
 0x20d   :  { %366 = vpow2.f32 %v182_v2 }
 0x214   :  { %v361_v56 = vpop.eup %360 }
 0x215   :  { %v158_v57 = vmul.f32 1.0614054, %v361_v56 }
 0x217   :  { %v160_v60 = vadd.f32 -1.4531521, %v158_v57 }
 0x218   :  { %v363_v61 = vpop.eup %362 }
 0x219   :  { %v162_v62 = vmul.f32 %v361_v56, %v160_v60  ;;  %v159_v63 = vmul.f32 1.0614054, %v363_v61  ;;  %v365_v15 = vpop.eup %364 }
 0x21a   :  { %v367_v20 = vpop.eup %366 }
 0x21b   :  { %v164_v3 = vadd.f32 1.4214138, %v162_v62  ;;  %v161_v4 = vadd.f32 -1.4531521, %v159_v63 }
 0x21d   :  { %v166_v5 = vmul.f32 %v361_v56, %v164_v3  ;;  %v163_v6 = vmul.f32 %v363_v61, %v161_v4 }
 0x21f   :  { %v168_v7 = vadd.f32 -0.28449672, %v166_v5  ;;  %v165_v8 = vadd.f32 1.4214138, %v163_v6 }
 0x221   :  { %v170_v9 = vmul.f32 %v361_v56, %v168_v7  ;;  %v167_v10 = vmul.f32 %v363_v61, %v165_v8 }
 0x223   :  { %v172_v11 = vadd.f32 0.2548296, %v170_v9  ;;  %v169_v12 = vadd.f32 -0.28449672, %v167_v10 }
 0x225   :  { %v174_v13 = vmul.f32 %v361_v56, %v172_v11  ;;  %v171_v14 = vmul.f32 %v363_v61, %v169_v12 }
 0x227   :  { %v184_v16 = vmul.f32 %v365_v15, %v174_v13  ;;  %v173_v17 = vadd.f32 0.2548296, %v171_v14 }
 0x229   :  { %v186_v18 = vsub.f32 1.0, %v184_v16  ;;  %v175_v19 = vmul.f32 %v363_v61, %v173_v17 }
 0x22b   :  { %v190_v21 = vsub.f32 0.0, %v186_v18  ;;  %v185_v22 = vmul.f32 %v367_v20, %v175_v19 }
 0x22d   :  { %v192_v23 = vsel %vm188_vm2, %v186_v18, %v190_v21  ;;  %v187_v24 = vsub.f32 1.0, %v185_v22 }
 0x22e   :  { %v194_v26 = vadd.f32 1.0, %v192_v23 }
 0x22f   :  { %v191_v25 = vsub.f32 0.0, %v187_v24 }
 0x230   :  { %v196_v31 = vmul.f32 %v194_v26, %v146_v28 }
 0x231   :  { %v193_v27 = vsel %vm189_vm3, %v187_v24, %v191_v25 }
 0x232   :  { %v195_v30 = vadd.f32 1.0, %v193_v27 }
 0x234   :  { %v197_v32 = vmul.f32 %v195_v30, %v147_v29 }
 0x236   :  { %v198_v33 = vpack.c.bf16 %v197_v32, %v196_v31 }
 0x238   :  { %345 = vmatmul.mubr.msk.bf16.vlgmr.msra.gmra.mxu1 %vm238_vm4, %v198_v33 }
 0x2f8   :  { %v276_v35 = vpop.f32.mrf.mxu1 }
 0x2f9   :  { %v277_v36 = vadd.f32 %v310_v34, %v276_v35 }
 0x2fa   :  { %v346_v38 = vpop.f32.mrf.mxu1 }
 0x2fb   :  { %v283_v39 = vadd.f32 %v277_v36, %v418_v0 }
 0x2fc   :  { %v279_v40 = vpop.f32.mrf.mxu1 }
 0x2fd   :  { %v287_v41 = vadd.f32 %v285_v37, %v283_v39  ;;  %v280_v42 = vadd.f32 %v310_v34, %v279_v40 }
 0x2fe   :  { %v347_v44 = vpop.f32.mrf.mxu1 }
 0x2ff   :  { %v318_v45 = vpack.c.bf16 %v287_v41, %v287_v41  ;;  %v284_v46 = vadd.f32 %v280_v42, %v423_v1 }
 0x301   :  { %298 = vst.msk [vmem:[%s486_s8] sm:$0xf] %vm297_vm5, %v318_v45  ;;  %v288_v47 = vadd.f32 %v286_v43, %v284_v46 }
 0x303   :  { %v319_v48 = vpack.c.bf16 %v288_v47, %v288_v47 }
 0x305   :  { %299 = vst.msk [vmem:[%s486_s8 + $0x4] sm:$0xf] %vm297_vm5, %v319_v48 }

// kernel: _lambda_.7
= control target key start
LH: loop header
LB: loop body
LE: loop exit
PB: predicated region body
PF: predicated region fallthrough
CT: control target
= control target key end

     0   :  { %vm19_vm0 = vcmask 261120   ;;  %v317_v1 = vmov 0.0   ;;  %vm260_vm3 = vcmask 257024   ;;  %s411_s1 = inlined_call_operand.vmem [shape: bf16[32,32], index: 1, kind: input, shape index: {}]   ;;  %s412_s0 = inlined_call_operand.vmem [shape: bf16[32,32], index: 0, kind: input, shape index: {}]   ;;  %s413_s2 = inlined_call_operand.vmem [shape: f32[1,32], index: 2, kind: input, shape index: {}]   ;;  %s414_s3 = inlined_call_operand.vmem [shape: bf16[32,32], index: 3, kind: output, shape index: {}]  }
   0x1   :  { %v297_v0 = vld [vmem:[%s411_s1 + $0x8] sm:$0xff]   ;;  %22 = vst.msk [vmem:[#allocation2 + $0x10] sm:$0xff] %vm19_vm0, %v317_v1  ;;  %20 = vst.msk [vmem:[#allocation2] sm:$0xff] %vm19_vm0, %v317_v1  ;;  %v298_v2 = vld [vmem:[%s411_s1] sm:$0xff]  }
   0x2   :  { %21 = vst.msk [vmem:[#allocation2 + $0x8] sm:$0xff] %vm19_vm0, %v317_v1  ;;  %23 = vst.msk [vmem:[#allocation2 + $0x18] sm:$0xff] %vm19_vm0, %v317_v1  ;;  %288 = vmatprep.subr.bf16.mxu0 %v297_v0  ;;  %v299_v3 = vld [vmem:[%s412_s0] sm:$0xff]   ;;  %v300_v4 = vld [vmem:[%s412_s0 + $0x8] sm:$0xff]  }
   0x3   :  { %289 = vmatpush3.bf16.msra.mxu0 %v297_v0  ;;  %292 = vmatprep.mubr.msk.bf16.mxu0 %vm19_vm0, %v299_v3  ;;  %v275_v17 = vld [vmem:[%s413_s2] ss:$0 sm:$0xff] }
   0x4   :  { %290 = vmatprep.subr.bf16.mxu0 %v298_v2 }
   0x7   :  { %291 = vmatpush3.bf16.msra.mxu0 %v298_v2 }
   0x8   :  { %v26_v5 = vld [vmem:[#allocation2 + $0x10] sm:$0xff]  ;;  %v24_v7 = vld [vmem:[#allocation2] sm:$0xff] }
   0x9   :  { %v27_v10 = vld [vmem:[#allocation2 + $0x18] sm:$0xff]  ;;  %v25_v13 = vld [vmem:[#allocation2 + $0x8] sm:$0xff] }
   0xa   :  { %293 = vmatmul.mubr.msk.bf16.vlgmr.msra.gmra.mxu0 %vm19_vm0, %v300_v4 }
  0xca   :  { %v294_v6 = vpop.f32.mrf.mxu0 }
  0xcb   :  { %v116_v8 = vadd.f32 %v294_v6, %v26_v5 }
  0xcc   :  { %v99_v9 = vpop.f32.mrf.mxu0 }
  0xcd   :  { %120 = vst.msk [vmem:[#allocation2 + $0x10] sm:$0xff] %vm19_vm0, %v116_v8  ;;  %v114_v11 = vadd.f32 %v99_v9, %v24_v7 }
  0xce   :  { %v295_v12 = vpop.f32.mrf.mxu0 }
  0xcf   :  { %118 = vst.msk [vmem:[#allocation2] sm:$0xff] %vm19_vm0, %v114_v11  ;;  %v117_v14 = vadd.f32 %v295_v12, %v27_v10 }
  0xd0   :  { %v102_v15 = vpop.f32.mrf.mxu0 }
  0xd1   :  { %121 = vst.msk [vmem:[#allocation2 + $0x18] sm:$0xff] %vm19_vm0, %v117_v14  ;;  %v115_v16 = vadd.f32 %v102_v15, %v25_v13 }
  0xd3   :  { %119 = vst.msk [vmem:[#allocation2 + $0x8] sm:$0xff] %vm19_vm0, %v115_v16 }
  0xd4   :  { %v127_v18 = vld [vmem:[#allocation2 + $0x10] sm:$0xff] }
  0xd5   :  { %v363_v19 = vadd.f32 %v275_v17, %v127_v18 }
  0xd6   :  { %v125_v20 = vld [vmem:[#allocation2] sm:$0xff] }
  0xd7   :  { %v366_v21 = vmul.f32 0.70710677, %v363_v19  ;;  %v368_v22 = vadd.f32 %v275_v17, %v125_v20 }
  0xd8   :  { %v128_v23 = vld [vmem:[#allocation2 + $0x18] sm:$0xff] }
  0xd9   :  { %v150_v24 = vand.u32 2147483647, %v366_v21  ;;  %v372_v25 = vmul.f32 0.70710677, %v368_v22  ;;  %v374_v26 = vadd.f32 %v275_v17, %v128_v23  ;;  %vm226_vm1 = vcmp.ge.f32.partialorder %v366_v21, 0.0 }
  0xda   :  { %v126_v27 = vld [vmem:[#allocation2 + $0x8] sm:$0xff] }
  0xdb   :  { %v154_v28 = vmul.f32 0.3275911, %v150_v24  ;;  %v148_v29 = vand.u32 2147483647, %v372_v25  ;;  %v378_v30 = vmul.f32 0.70710677, %v374_v26  ;;  %v380_v31 = vadd.f32 %v275_v17, %v126_v27 }
  0xdc   :  { %v202_v42 = vsub.f32 0.0, %v150_v24  ;;  %vm224_vm2 = vcmp.ge.f32.partialorder %v372_v25, 0.0 }
  0xdd   :  { %v158_v32 = vadd.f32 1.0, %v154_v28  ;;  %v152_v33 = vmul.f32 0.3275911, %v148_v29  ;;  %v151_v34 = vand.u32 2147483647, %v378_v30  ;;  %v200_v43 = vsub.f32 0.0, %v148_v29 }
  0xde   :  { %v384_v35 = vmul.f32 0.70710677, %v380_v31  ;;  %v206_v44 = vmul.f32 %v202_v42, %v150_v24  ;;  %vm227_vm4 = vcmp.ge.f32.partialorder %v378_v30, 0.0  ;;  %v141_v30 = vmul.f32 0.5, %v380_v31 }
  0xdf   :  { %301 = vrcp.f32 %v158_v32  ;;  %v156_v36 = vadd.f32 1.0, %v152_v33  ;;  %v155_v37 = vmul.f32 0.3275911, %v151_v34  ;;  %v203_v45 = vsub.f32 0.0, %v151_v34 }
  0xe0   :  { %v149_v38 = vand.u32 2147483647, %v384_v35  ;;  %v204_v47 = vmul.f32 %v200_v43, %v148_v29  ;;  %v212_v49 = vmul.f32 1.442695, %v206_v44  ;;  %vm225_vm5 = vcmp.ge.f32.partialorder %v384_v35, 0.0 }
  0xe1   :  { %303 = vrcp.f32 %v156_v36  ;;  %v159_v39 = vadd.f32 1.0, %v155_v37  ;;  %v207_v51 = vmul.f32 %v203_v45, %v151_v34 }
  0xe2   :  { %v153_v40 = vmul.f32 0.3275911, %v149_v38  ;;  %v201_v50 = vsub.f32 0.0, %v149_v38  ;;  %v208_v55 = vmul.f32 1.442695, %v204_v47 }
  0xe3   :  { %305 = vrcp.f32 %v159_v39  ;;  %v214_v61 = vmul.f32 1.442695, %v207_v51 }
  0xe4   :  { %v157_v41 = vadd.f32 1.0, %v153_v40  ;;  %v205_v58 = vmul.f32 %v201_v50, %v149_v38 }
  0xe6   :  { %307 = vrcp.f32 %v157_v41  ;;  %v210_v4 = vmul.f32 1.442695, %v205_v58 }
  0xe7   :  { %309 = vpow2.f32 %v212_v49  ;;  %v142_v49 = vmul.f32 0.5, %v363_v19  ;;  %v143_v19 = vmul.f32 0.5, %v374_v26 }
  0xe8   :  { %311 = vpow2.f32 %v208_v55 }
  0xe9   :  { %313 = vpow2.f32 %v214_v61 }
  0xea   :  { %315 = vpow2.f32 %v210_v4 }
  0xec   :  { %v302_v46 = vpop.eup %301 }
  0xed   :  { %v166_v48 = vmul.f32 1.0614054, %v302_v46 }
  0xee   :  { %v304_v52 = vpop.eup %303 }
  0xef   :  { %v170_v53 = vadd.f32 -1.4531521, %v166_v48  ;;  %v164_v54 = vmul.f32 1.0614054, %v304_v52 }
  0xf0   :  { %v306_v56 = vpop.eup %305 }
  0xf1   :  { %v174_v57 = vmul.f32 %v302_v46, %v170_v53  ;;  %v168_v59 = vadd.f32 -1.4531521, %v164_v54  ;;  %v167_v60 = vmul.f32 1.0614054, %v306_v56 }
  0xf3   :  { %v178_v62 = vadd.f32 1.4214138, %v174_v57  ;;  %v308_v63 = vpop.eup %307  ;;  %v172_v0 = vmul.f32 %v304_v52, %v168_v59  ;;  %v171_v1 = vadd.f32 -1.4531521, %v167_v60  ;;  %v140_v57 = vmul.f32 0.5, %v368_v22 }
  0xf4   :  { %v165_v3 = vmul.f32 1.0614054, %v308_v63  ;;  %v310_v24 = vpop.eup %309 }
  0xf5   :  { %v182_v2 = vmul.f32 %v302_v46, %v178_v62  ;;  %v176_v5 = vadd.f32 1.4214138, %v172_v0  ;;  %v175_v6 = vmul.f32 %v306_v56, %v171_v1  ;;  %v312_v36 = vpop.eup %311 }
  0xf6   :  { %v169_v8 = vadd.f32 -1.4531521, %v165_v3  ;;  %v314_v41 = vpop.eup %313 }
  0xf7   :  { %v186_v7 = vadd.f32 -0.28449672, %v182_v2  ;;  %v180_v9 = vmul.f32 %v304_v52, %v176_v5  ;;  %v179_v10 = vadd.f32 1.4214138, %v175_v6  ;;  %v316_v48 = vpop.eup %315 }
  0xf8   :  { %v173_v12 = vmul.f32 %v308_v63, %v169_v8 }
  0xf9   :  { %v190_v11 = vmul.f32 %v302_v46, %v186_v7  ;;  %v184_v13 = vadd.f32 -0.28449672, %v180_v9  ;;  %v183_v14 = vmul.f32 %v306_v56, %v179_v10 }
  0xfa   :  { %v177_v16 = vadd.f32 1.4214138, %v173_v12 }
  0xfb   :  { %v194_v15 = vadd.f32 0.2548296, %v190_v11  ;;  %v188_v17 = vmul.f32 %v304_v52, %v184_v13  ;;  %v187_v18 = vadd.f32 -0.28449672, %v183_v14 }
  0xfc   :  { %v181_v23 = vmul.f32 %v308_v63, %v177_v16 }
  0xfd   :  { %v198_v20 = vmul.f32 %v302_v46, %v194_v15  ;;  %v192_v27 = vadd.f32 0.2548296, %v188_v17  ;;  %v191_v28 = vmul.f32 %v306_v56, %v187_v18 }
  0xfe   :  { %v185_v32 = vadd.f32 -0.28449672, %v181_v23 }
  0xff   :  { %v218_v29 = vmul.f32 %v310_v24, %v198_v20  ;;  %v196_v33 = vmul.f32 %v304_v52, %v192_v27  ;;  %v195_v34 = vadd.f32 0.2548296, %v191_v28 }
 0x100   :  { %v189_v38 = vmul.f32 %v308_v63, %v185_v32 }
 0x101   :  { %v222_v37 = vsub.f32 1.0, %v218_v29  ;;  %v216_v39 = vmul.f32 %v312_v36, %v196_v33  ;;  %v199_v40 = vmul.f32 %v306_v56, %v195_v34 }
 0x102   :  { %v193_v43 = vadd.f32 0.2548296, %v189_v38 }
 0x103   :  { %v230_v42 = vsub.f32 0.0, %v222_v37  ;;  %v220_v44 = vsub.f32 1.0, %v216_v39  ;;  %v219_v45 = vmul.f32 %v314_v41, %v199_v40 }
 0x104   :  { %v197_v47 = vmul.f32 %v308_v63, %v193_v43 }
 0x105   :  { %v234_v46 = vsel %vm226_vm1, %v222_v37, %v230_v42  ;;  %v228_v51 = vsub.f32 0.0, %v220_v44  ;;  %v223_v52 = vsub.f32 1.0, %v219_v45 }
 0x106   :  { %v238_v50 = vadd.f32 1.0, %v234_v46  ;;  %v217_v53 = vmul.f32 %v316_v48, %v197_v47 }
 0x107   :  { %v232_v55 = vsel %vm224_vm2, %v220_v44, %v228_v51  ;;  %v231_v56 = vsub.f32 0.0, %v223_v52 }
 0x108   :  { %v242_v54 = vmul.f32 %v238_v50, %v142_v49  ;;  %v236_v21 = vadd.f32 1.0, %v232_v55  ;;  %v221_v58 = vsub.f32 1.0, %v217_v53 }
 0x109   :  { %v235_v60 = vsel %vm227_vm4, %v223_v52, %v231_v56 }
 0x10a   :  { %v282_v59 = vpack.c.bf16 %v242_v54, %v242_v54  ;;  %v240_v61 = vmul.f32 %v236_v21, %v140_v57  ;;  %v239_v62 = vadd.f32 1.0, %v235_v60  ;;  %v229_v63 = vsub.f32 0.0, %v221_v58 }
 0x10c   :  { %263 = vst.msk [vmem:[%s414_s3 + $0x8] sm:$0xf] %vm260_vm3, %v282_v59  ;;  %v280_v25 = vpack.c.bf16 %v240_v61, %v240_v61  ;;  %v243_v22 = vmul.f32 %v239_v62, %v143_v19  ;;  %v233_v0 = vsel %vm225_vm5, %v221_v58, %v229_v63 }
 0x10d   :  { %v237_v1 = vadd.f32 1.0, %v233_v0 }
 0x10e   :  { %261 = vst.msk [vmem:[%s414_s3] sm:$0xf] %vm260_vm3, %v280_v25  ;;  %v283_v26 = vpack.c.bf16 %v243_v22, %v243_v22 }
 0x10f   :  { %v241_v2 = vmul.f32 %v237_v1, %v141_v30 }
 0x110   :  { %264 = vst.msk [vmem:[%s414_s3 + $0xc] sm:$0xf] %vm260_vm3, %v283_v26 }
 0x111   :  { %v281_v3 = vpack.c.bf16 %v241_v2, %v241_v2 }
 0x113   :  { %262 = vst.msk [vmem:[%s414_s3 + $0x4] sm:$0xf] %vm260_vm3, %v281_v3 }

// kernel: _lambda_.8
= control target key start
LH: loop header
LB: loop body
LE: loop exit
PB: predicated region body
PF: predicated region fallthrough
CT: control target
= control target key end

     0   :  { %s2173_s12 = smov 0   ;;  %s2175_s13 = smov 0   ;;  %s2653_s0 = inlined_call_operand.vmem [shape: bf16[16,512], index: 0, kind: input, shape index: {}]   ;;  %s2654_s1 = inlined_call_operand.vmem [shape: bf16[512,768], index: 1, kind: input, shape index: {}]   ;;  %s2655_s2 = inlined_call_operand.vmem [shape: f32[1,768], index: 2, kind: input, shape index: {}]   ;;  %s2656_s3 = inlined_call_operand.vmem [shape: f32[16,768], index: 3, kind: output, shape index: {}]  }
   0x1   :  { %s2177_s14 = smov 0   ;;  %s2179_s15 = smov 0  }
   0x2   :  { %s2181_s16 = smov 0  }
   0x3 LB: > { %s28_s17 = sadd.s32 1, %s2147_s15  ;;  %s1622_s18 = sadd.s32 4294967295, %s2151_s16   ;;  %s2151_s16 = sphi %s2181_s16, %s13_s16   ;;  %s2147_s15 = sphi %s2179_s15, %s2661_s15   ;;  %s2143_s14 = sphi %s2177_s14, %s2660_s14   ;;  %s2139_s13 = sphi %s2175_s13, %s2659_s13   ;;  %s2135_s12 = sphi %s2173_s12, %s2658_s12  }
   0x4   : > { %p30_p0 = scmp.ge.s32.totalorder %s28_s17, 2  ;;  %p76_p1 = scmp.ne.s32.totalorder %s2139_s13, %s2135_s12 }
   0x5   : > { %p77_p2 = scmp.eq.s32.totalorder %s2151_s16, 0  ;;  %p134_p4 = scmp.eq.s32.totalorder %s1622_s18, 1 }
   0x6   : > { %s2663_s17 = smov (%p30_p0, %s28_s17), 0  ;;  %s69_s20 = sadd.s32 1, %s2139_s13 }
   0x7   : > { %p78_p3 = por %p77_p2, %p76_p1  ;;  %s65_s19 = ssub.s32 %s2147_s15, %s2663_s17 }
   0x8   : > { %p67_p5 = scmp.eq.s32.totalorder %s65_s19, 0  ;;  %p2208_p6 = por %p134_p4, %p76_p1 }
   0x9   : > { %p1626_p7 = scmp.ge.s32.totalorder %s2151_s16, 2 }
   0xa   : > { %s2213_s22 = scalar_select %p67_p5, %s2139_s13, %s69_s20  }
   0xb   : > { %171 = sbr.rel (%p1626_p7) target bundleno = 95 (0x5f), region = 20 }
  0x10   : > { %174 = sbr.rel (!%p78_p3) target bundleno = 95 (0x5f), region = 24  ;;  %s176_s23 = sand.u32 (%p78_p3), 1, %s2139_s13  }
  0x11   : > { %s1866_s24 = smul.u32 (%p78_p3), 12, %s2147_s15 }
  0x12   : > { %s1912_s25 = smul.u32 (%p78_p3), 768, %s176_s23 }
  0x13   : > { %s2221_s28 = scalar_lea.vmem (%p78_p3), %s2654_s1, %s1866_s24 }
  0x14   : > { %v199_v0 = vld [vmem:[%s2221_s28] sm:$0xff] (%p78_p3)  ;;  %v201_v1 = vld [vmem:[%s2221_s28 + $0x18] sm:$0xff] (%p78_p3)  ;;  %v203_v2 = vld [vmem:[%s2221_s28 + $0x30] sm:$0xff] (%p78_p3)  ;;  %s2226_s29 = scalar_lea.vmem (%p78_p3), [#allocation3], %s1912_s25 }
  0x15   : > { %200 = vst [vmem:[%s2226_s29] sm:$0xff] %v199_v0  ;;  %202 = vst [vmem:[%s2226_s29 + $0xc] sm:$0xff] %v201_v1  ;;  %v205_v3 = vld [vmem:[%s2221_s28 + $0x48] sm:$0xff]  ;;  %v207_v4 = vld [vmem:[%s2221_s28 + $0x60] sm:$0xff] }
  0x16   : > { %204 = vst [vmem:[%s2226_s29 + $0x18] sm:$0xff] %v203_v2  ;;  %v209_v5 = vld [vmem:[%s2221_s28 + $0x78] sm:$0xff]  ;;  %206 = vst [vmem:[%s2226_s29 + $0x24] sm:$0xff] %v205_v3  ;;  %v211_v6 = vld [vmem:[%s2221_s28 + $0x90] sm:$0xff] }
  0x17   : > { %208 = vst [vmem:[%s2226_s29 + $0x30] sm:$0xff] %v207_v4  ;;  %210 = vst [vmem:[%s2226_s29 + $0x3c] sm:$0xff] %v209_v5  ;;  %v213_v7 = vld [vmem:[%s2221_s28 + $0xa8] sm:$0xff]  ;;  %v215_v8 = vld [vmem:[%s2221_s28 + $0xc0] sm:$0xff] }
  0x18   : > { %212 = vst [vmem:[%s2226_s29 + $0x48] sm:$0xff] %v211_v6  ;;  %214 = vst [vmem:[%s2226_s29 + $0x54] sm:$0xff] %v213_v7  ;;  %v217_v9 = vld [vmem:[%s2221_s28 + $0xd8] sm:$0xff]  ;;  %v219_v10 = vld [vmem:[%s2221_s28 + $0xf0] sm:$0xff] }
  0x19   : > { %216 = vst [vmem:[%s2226_s29 + $0x60] sm:$0xff] %v215_v8  ;;  %v221_v11 = vld [vmem:[%s2221_s28 + $0x108] sm:$0xff]  ;;  %218 = vst [vmem:[%s2226_s29 + $0x6c] sm:$0xff] %v217_v9  ;;  %v223_v12 = vld [vmem:[%s2221_s28 + $0x120] sm:$0xff] }
  0x1a   : > { %220 = vst [vmem:[%s2226_s29 + $0x78] sm:$0xff] %v219_v10  ;;  %222 = vst [vmem:[%s2226_s29 + $0x84] sm:$0xff] %v221_v11  ;;  %v225_v13 = vld [vmem:[%s2221_s28 + $0x138] sm:$0xff]  ;;  %v227_v14 = vld [vmem:[%s2221_s28 + $0x150] sm:$0xff] }
  0x1b   : > { %224 = vst [vmem:[%s2226_s29 + $0x90] sm:$0xff] %v223_v12  ;;  %226 = vst [vmem:[%s2226_s29 + $0x9c] sm:$0xff] %v225_v13  ;;  %v229_v15 = vld [vmem:[%s2221_s28 + $0x168] sm:$0xff]  ;;  %v231_v16 = vld [vmem:[%s2221_s28 + $0x180] sm:$0xff] }
  0x1c   : > { %228 = vst [vmem:[%s2226_s29 + $0xa8] sm:$0xff] %v227_v14  ;;  %v233_v17 = vld [vmem:[%s2221_s28 + $0x198] sm:$0xff]  ;;  %230 = vst [vmem:[%s2226_s29 + $0xb4] sm:$0xff] %v229_v15  ;;  %v235_v18 = vld [vmem:[%s2221_s28 + $0x1b0] sm:$0xff] }
  0x1d   : > { %232 = vst [vmem:[%s2226_s29 + $0xc0] sm:$0xff] %v231_v16  ;;  %234 = vst [vmem:[%s2226_s29 + $0xcc] sm:$0xff] %v233_v17  ;;  %v237_v19 = vld [vmem:[%s2221_s28 + $0x1c8] sm:$0xff]  ;;  %v239_v20 = vld [vmem:[%s2221_s28 + $0x1e0] sm:$0xff] }
  0x1e   : > { %236 = vst [vmem:[%s2226_s29 + $0xd8] sm:$0xff] %v235_v18  ;;  %238 = vst [vmem:[%s2226_s29 + $0xe4] sm:$0xff] %v237_v19  ;;  %v241_v21 = vld [vmem:[%s2221_s28 + $0x1f8] sm:$0xff]  ;;  %v243_v22 = vld [vmem:[%s2221_s28 + $0x210] sm:$0xff] }
  0x1f   : > { %240 = vst [vmem:[%s2226_s29 + $0xf0] sm:$0xff] %v239_v20  ;;  %v245_v23 = vld [vmem:[%s2221_s28 + $0x228] sm:$0xff]  ;;  %242 = vst [vmem:[%s2226_s29 + $0xfc] sm:$0xff] %v241_v21  ;;  %v247_v24 = vld [vmem:[%s2221_s28 + $0x240] sm:$0xff] }
  0x20   : > { %244 = vst [vmem:[%s2226_s29 + $0x108] sm:$0xff] %v243_v22  ;;  %246 = vst [vmem:[%s2226_s29 + $0x114] sm:$0xff] %v245_v23  ;;  %v249_v25 = vld [vmem:[%s2221_s28 + $0x258] sm:$0xff]  ;;  %v251_v26 = vld [vmem:[%s2221_s28 + $0x270] sm:$0xff] }
  0x21   : > { %248 = vst [vmem:[%s2226_s29 + $0x120] sm:$0xff] %v247_v24  ;;  %250 = vst [vmem:[%s2226_s29 + $0x12c] sm:$0xff] %v249_v25  ;;  %v253_v27 = vld [vmem:[%s2221_s28 + $0x288] sm:$0xff]  ;;  %v255_v28 = vld [vmem:[%s2221_s28 + $0x2a0] sm:$0xff] }
  0x22   : > { %252 = vst [vmem:[%s2226_s29 + $0x138] sm:$0xff] %v251_v26  ;;  %v257_v29 = vld [vmem:[%s2221_s28 + $0x2b8] sm:$0xff]  ;;  %254 = vst [vmem:[%s2226_s29 + $0x144] sm:$0xff] %v253_v27  ;;  %v259_v30 = vld [vmem:[%s2221_s28 + $0x2d0] sm:$0xff] }
  0x23   : > { %256 = vst [vmem:[%s2226_s29 + $0x150] sm:$0xff] %v255_v28  ;;  %258 = vst [vmem:[%s2226_s29 + $0x15c] sm:$0xff] %v257_v29  ;;  %v261_v31 = vld [vmem:[%s2221_s28 + $0x2e8] sm:$0xff]  ;;  %v263_v32 = vld [vmem:[%s2221_s28 + $0x300] sm:$0xff] }
  0x24   : > { %260 = vst [vmem:[%s2226_s29 + $0x168] sm:$0xff] %v259_v30  ;;  %262 = vst [vmem:[%s2226_s29 + $0x174] sm:$0xff] %v261_v31  ;;  %v265_v33 = vld [vmem:[%s2221_s28 + $0x318] sm:$0xff]  ;;  %v267_v34 = vld [vmem:[%s2221_s28 + $0x330] sm:$0xff] }
  0x25   : > { %264 = vst [vmem:[%s2226_s29 + $0x180] sm:$0xff] %v263_v32  ;;  %v269_v35 = vld [vmem:[%s2221_s28 + $0x348] sm:$0xff]  ;;  %266 = vst [vmem:[%s2226_s29 + $0x18c] sm:$0xff] %v265_v33  ;;  %v271_v36 = vld [vmem:[%s2221_s28 + $0x360] sm:$0xff] }
  0x26   : > { %268 = vst [vmem:[%s2226_s29 + $0x198] sm:$0xff] %v267_v34  ;;  %270 = vst [vmem:[%s2226_s29 + $0x1a4] sm:$0xff] %v269_v35  ;;  %v273_v37 = vld [vmem:[%s2221_s28 + $0x378] sm:$0xff]  ;;  %v275_v38 = vld [vmem:[%s2221_s28 + $0x390] sm:$0xff] }
  0x27   : > { %272 = vst [vmem:[%s2226_s29 + $0x1b0] sm:$0xff] %v271_v36  ;;  %274 = vst [vmem:[%s2226_s29 + $0x1bc] sm:$0xff] %v273_v37  ;;  %v277_v39 = vld [vmem:[%s2221_s28 + $0x3a8] sm:$0xff]  ;;  %v279_v40 = vld [vmem:[%s2221_s28 + $0x3c0] sm:$0xff] }
  0x28   : > { %276 = vst [vmem:[%s2226_s29 + $0x1c8] sm:$0xff] %v275_v38  ;;  %v281_v41 = vld [vmem:[%s2221_s28 + $0x3d8] sm:$0xff]  ;;  %278 = vst [vmem:[%s2226_s29 + $0x1d4] sm:$0xff] %v277_v39  ;;  %v283_v42 = vld [vmem:[%s2221_s28 + $0x3f0] sm:$0xff] }
  0x29   : > { %280 = vst [vmem:[%s2226_s29 + $0x1e0] sm:$0xff] %v279_v40  ;;  %282 = vst [vmem:[%s2226_s29 + $0x1ec] sm:$0xff] %v281_v41  ;;  %v285_v43 = vld [vmem:[%s2221_s28 + $0x408] sm:$0xff]  ;;  %v287_v44 = vld [vmem:[%s2221_s28 + $0x420] sm:$0xff] }
  0x2a   : > { %284 = vst [vmem:[%s2226_s29 + $0x1f8] sm:$0xff] %v283_v42  ;;  %286 = vst [vmem:[%s2226_s29 + $0x204] sm:$0xff] %v285_v43  ;;  %v289_v45 = vld [vmem:[%s2221_s28 + $0x438] sm:$0xff]  ;;  %v291_v46 = vld [vmem:[%s2221_s28 + $0x450] sm:$0xff] }
  0x2b   : > { %288 = vst [vmem:[%s2226_s29 + $0x210] sm:$0xff] %v287_v44  ;;  %v293_v47 = vld [vmem:[%s2221_s28 + $0x468] sm:$0xff]  ;;  %290 = vst [vmem:[%s2226_s29 + $0x21c] sm:$0xff] %v289_v45  ;;  %v295_v48 = vld [vmem:[%s2221_s28 + $0x480] sm:$0xff] }
  0x2c   : > { %292 = vst [vmem:[%s2226_s29 + $0x228] sm:$0xff] %v291_v46  ;;  %294 = vst [vmem:[%s2226_s29 + $0x234] sm:$0xff] %v293_v47  ;;  %v297_v49 = vld [vmem:[%s2221_s28 + $0x498] sm:$0xff]  ;;  %v299_v50 = vld [vmem:[%s2221_s28 + $0x4b0] sm:$0xff] }
  0x2d   : > { %296 = vst [vmem:[%s2226_s29 + $0x240] sm:$0xff] %v295_v48  ;;  %298 = vst [vmem:[%s2226_s29 + $0x24c] sm:$0xff] %v297_v49  ;;  %v301_v51 = vld [vmem:[%s2221_s28 + $0x4c8] sm:$0xff]  ;;  %v303_v52 = vld [vmem:[%s2221_s28 + $0x4e0] sm:$0xff] }
  0x2e   : > { %300 = vst [vmem:[%s2226_s29 + $0x258] sm:$0xff] %v299_v50  ;;  %v305_v53 = vld [vmem:[%s2221_s28 + $0x4f8] sm:$0xff]  ;;  %302 = vst [vmem:[%s2226_s29 + $0x264] sm:$0xff] %v301_v51  ;;  %v307_v54 = vld [vmem:[%s2221_s28 + $0x510] sm:$0xff] }
  0x2f   : > { %304 = vst [vmem:[%s2226_s29 + $0x270] sm:$0xff] %v303_v52  ;;  %306 = vst [vmem:[%s2226_s29 + $0x27c] sm:$0xff] %v305_v53  ;;  %v309_v55 = vld [vmem:[%s2221_s28 + $0x528] sm:$0xff]  ;;  %v311_v56 = vld [vmem:[%s2221_s28 + $0x540] sm:$0xff] }
  0x30   : > { %308 = vst [vmem:[%s2226_s29 + $0x288] sm:$0xff] %v307_v54  ;;  %310 = vst [vmem:[%s2226_s29 + $0x294] sm:$0xff] %v309_v55  ;;  %v313_v57 = vld [vmem:[%s2221_s28 + $0x558] sm:$0xff]  ;;  %v315_v58 = vld [vmem:[%s2221_s28 + $0x570] sm:$0xff] }
  0x31   : > { %312 = vst [vmem:[%s2226_s29 + $0x2a0] sm:$0xff] %v311_v56  ;;  %v317_v59 = vld [vmem:[%s2221_s28 + $0x588] sm:$0xff]  ;;  %314 = vst [vmem:[%s2226_s29 + $0x2ac] sm:$0xff] %v313_v57  ;;  %v319_v60 = vld [vmem:[%s2221_s28 + $0x5a0] sm:$0xff] }
  0x32   : > { %316 = vst [vmem:[%s2226_s29 + $0x2b8] sm:$0xff] %v315_v58  ;;  %318 = vst [vmem:[%s2226_s29 + $0x2c4] sm:$0xff] %v317_v59  ;;  %v321_v61 = vld [vmem:[%s2221_s28 + $0x5b8] sm:$0xff]  ;;  %v323_v62 = vld [vmem:[%s2221_s28 + $0x5d0] sm:$0xff] }
  0x33   : > { %320 = vst [vmem:[%s2226_s29 + $0x2d0] sm:$0xff] %v319_v60  ;;  %322 = vst [vmem:[%s2226_s29 + $0x2dc] sm:$0xff] %v321_v61  ;;  %v325_v63 = vld [vmem:[%s2221_s28 + $0x5e8] sm:$0xff]  ;;  %v1630_v1 = vld [vmem:[%s2221_s28 + $0x20] sm:$0xf] }
  0x34   : > { %324 = vst [vmem:[%s2226_s29 + $0x2e8] sm:$0xff] %v323_v62  ;;  %v1628_v0 = vld [vmem:[%s2221_s28 + $0x8] sm:$0xf]  ;;  %326 = vst [vmem:[%s2226_s29 + $0x2f4] sm:$0xff] %v325_v63  ;;  %v1632_v2 = vld [vmem:[%s2221_s28 + $0x38] sm:$0xf] }
  0x35   : > { %1629 = vst [vmem:[%s2226_s29 + $0x8] sm:$0xf] %v1628_v0  ;;  %1631 = vst [vmem:[%s2226_s29 + $0x14] sm:$0xf] %v1630_v1  ;;  %v1634_v3 = vld [vmem:[%s2221_s28 + $0x50] sm:$0xf] }
  0x36   : > { %v1636_v4 = vld [vmem:[%s2221_s28 + $0x68] sm:$0xf]  ;;  %1633 = vst [vmem:[%s2226_s29 + $0x20] sm:$0xf] %v1632_v2  ;;  %1635 = vst [vmem:[%s2226_s29 + $0x2c] sm:$0xf] %v1634_v3 }
  0x37   : > { %1637 = vst [vmem:[%s2226_s29 + $0x38] sm:$0xf] %v1636_v4  ;;  %v1638_v5 = vld [vmem:[%s2221_s28 + $0x80] sm:$0xf]  ;;  %v1640_v6 = vld [vmem:[%s2221_s28 + $0x98] sm:$0xf] }
  0x38   : > { %v1642_v7 = vld [vmem:[%s2221_s28 + $0xb0] sm:$0xf]  ;;  %1639 = vst [vmem:[%s2226_s29 + $0x44] sm:$0xf] %v1638_v5  ;;  %1641 = vst [vmem:[%s2226_s29 + $0x50] sm:$0xf] %v1640_v6 }
  0x39   : > { %1643 = vst [vmem:[%s2226_s29 + $0x5c] sm:$0xf] %v1642_v7  ;;  %v1644_v8 = vld [vmem:[%s2221_s28 + $0xc8] sm:$0xf]  ;;  %v1646_v9 = vld [vmem:[%s2221_s28 + $0xe0] sm:$0xf] }
  0x3a   : > { %v1648_v10 = vld [vmem:[%s2221_s28 + $0xf8] sm:$0xf]  ;;  %1645 = vst [vmem:[%s2226_s29 + $0x68] sm:$0xf] %v1644_v8  ;;  %1647 = vst [vmem:[%s2226_s29 + $0x74] sm:$0xf] %v1646_v9 }
  0x3b   : > { %1649 = vst [vmem:[%s2226_s29 + $0x80] sm:$0xf] %v1648_v10  ;;  %v1650_v11 = vld [vmem:[%s2221_s28 + $0x110] sm:$0xf]  ;;  %v1652_v12 = vld [vmem:[%s2221_s28 + $0x128] sm:$0xf] }
  0x3c   : > { %v1654_v13 = vld [vmem:[%s2221_s28 + $0x140] sm:$0xf]  ;;  %1651 = vst [vmem:[%s2226_s29 + $0x8c] sm:$0xf] %v1650_v11  ;;  %1653 = vst [vmem:[%s2226_s29 + $0x98] sm:$0xf] %v1652_v12 }
  0x3d   : > { %1655 = vst [vmem:[%s2226_s29 + $0xa4] sm:$0xf] %v1654_v13  ;;  %v1656_v14 = vld [vmem:[%s2221_s28 + $0x158] sm:$0xf]  ;;  %v1658_v15 = vld [vmem:[%s2221_s28 + $0x170] sm:$0xf] }
  0x3e   : > { %v1660_v16 = vld [vmem:[%s2221_s28 + $0x188] sm:$0xf]  ;;  %1657 = vst [vmem:[%s2226_s29 + $0xb0] sm:$0xf] %v1656_v14  ;;  %1659 = vst [vmem:[%s2226_s29 + $0xbc] sm:$0xf] %v1658_v15 }
  0x3f   : > { %1661 = vst [vmem:[%s2226_s29 + $0xc8] sm:$0xf] %v1660_v16  ;;  %v1662_v17 = vld [vmem:[%s2221_s28 + $0x1a0] sm:$0xf]  ;;  %v1664_v18 = vld [vmem:[%s2221_s28 + $0x1b8] sm:$0xf] }
  0x40   : > { %v1666_v19 = vld [vmem:[%s2221_s28 + $0x1d0] sm:$0xf]  ;;  %1663 = vst [vmem:[%s2226_s29 + $0xd4] sm:$0xf] %v1662_v17  ;;  %1665 = vst [vmem:[%s2226_s29 + $0xe0] sm:$0xf] %v1664_v18 }
  0x41   : > { %1667 = vst [vmem:[%s2226_s29 + $0xec] sm:$0xf] %v1666_v19  ;;  %v1668_v20 = vld [vmem:[%s2221_s28 + $0x1e8] sm:$0xf]  ;;  %v1670_v21 = vld [vmem:[%s2221_s28 + $0x200] sm:$0xf] }
  0x42   : > { %v1672_v22 = vld [vmem:[%s2221_s28 + $0x218] sm:$0xf]  ;;  %1669 = vst [vmem:[%s2226_s29 + $0xf8] sm:$0xf] %v1668_v20  ;;  %1671 = vst [vmem:[%s2226_s29 + $0x104] sm:$0xf] %v1670_v21 }
  0x43   : > { %1673 = vst [vmem:[%s2226_s29 + $0x110] sm:$0xf] %v1672_v22  ;;  %v1674_v23 = vld [vmem:[%s2221_s28 + $0x230] sm:$0xf]  ;;  %v1676_v24 = vld [vmem:[%s2221_s28 + $0x248] sm:$0xf] }
  0x44   : > { %v1678_v25 = vld [vmem:[%s2221_s28 + $0x260] sm:$0xf]  ;;  %1675 = vst [vmem:[%s2226_s29 + $0x11c] sm:$0xf] %v1674_v23  ;;  %1677 = vst [vmem:[%s2226_s29 + $0x128] sm:$0xf] %v1676_v24 }
  0x45   : > { %1679 = vst [vmem:[%s2226_s29 + $0x134] sm:$0xf] %v1678_v25  ;;  %v1680_v26 = vld [vmem:[%s2221_s28 + $0x278] sm:$0xf]  ;;  %v1682_v27 = vld [vmem:[%s2221_s28 + $0x290] sm:$0xf] }
  0x46   : > { %v1684_v28 = vld [vmem:[%s2221_s28 + $0x2a8] sm:$0xf]  ;;  %1681 = vst [vmem:[%s2226_s29 + $0x140] sm:$0xf] %v1680_v26  ;;  %1683 = vst [vmem:[%s2226_s29 + $0x14c] sm:$0xf] %v1682_v27 }
  0x47   : > { %1685 = vst [vmem:[%s2226_s29 + $0x158] sm:$0xf] %v1684_v28  ;;  %v1686_v29 = vld [vmem:[%s2221_s28 + $0x2c0] sm:$0xf]  ;;  %v1688_v30 = vld [vmem:[%s2221_s28 + $0x2d8] sm:$0xf] }
  0x48   : > { %v1690_v31 = vld [vmem:[%s2221_s28 + $0x2f0] sm:$0xf]  ;;  %1687 = vst [vmem:[%s2226_s29 + $0x164] sm:$0xf] %v1686_v29  ;;  %1689 = vst [vmem:[%s2226_s29 + $0x170] sm:$0xf] %v1688_v30 }
  0x49   : > { %1691 = vst [vmem:[%s2226_s29 + $0x17c] sm:$0xf] %v1690_v31  ;;  %v1692_v32 = vld [vmem:[%s2221_s28 + $0x308] sm:$0xf]  ;;  %v1694_v33 = vld [vmem:[%s2221_s28 + $0x320] sm:$0xf] }
  0x4a   : > { %v1696_v34 = vld [vmem:[%s2221_s28 + $0x338] sm:$0xf]  ;;  %1693 = vst [vmem:[%s2226_s29 + $0x188] sm:$0xf] %v1692_v32  ;;  %1695 = vst [vmem:[%s2226_s29 + $0x194] sm:$0xf] %v1694_v33 }
  0x4b   : > { %1697 = vst [vmem:[%s2226_s29 + $0x1a0] sm:$0xf] %v1696_v34  ;;  %v1698_v35 = vld [vmem:[%s2221_s28 + $0x350] sm:$0xf]  ;;  %v1700_v36 = vld [vmem:[%s2221_s28 + $0x368] sm:$0xf] }
  0x4c   : > { %v1702_v37 = vld [vmem:[%s2221_s28 + $0x380] sm:$0xf]  ;;  %1699 = vst [vmem:[%s2226_s29 + $0x1ac] sm:$0xf] %v1698_v35  ;;  %1701 = vst [vmem:[%s2226_s29 + $0x1b8] sm:$0xf] %v1700_v36 }
  0x4d   : > { %1703 = vst [vmem:[%s2226_s29 + $0x1c4] sm:$0xf] %v1702_v37  ;;  %v1704_v38 = vld [vmem:[%s2221_s28 + $0x398] sm:$0xf]  ;;  %v1706_v39 = vld [vmem:[%s2221_s28 + $0x3b0] sm:$0xf] }
  0x4e   : > { %v1708_v40 = vld [vmem:[%s2221_s28 + $0x3c8] sm:$0xf]  ;;  %1705 = vst [vmem:[%s2226_s29 + $0x1d0] sm:$0xf] %v1704_v38  ;;  %1707 = vst [vmem:[%s2226_s29 + $0x1dc] sm:$0xf] %v1706_v39 }
  0x4f   : > { %1709 = vst [vmem:[%s2226_s29 + $0x1e8] sm:$0xf] %v1708_v40  ;;  %v1710_v41 = vld [vmem:[%s2221_s28 + $0x3e0] sm:$0xf]  ;;  %v1712_v42 = vld [vmem:[%s2221_s28 + $0x3f8] sm:$0xf] }
  0x50   : > { %v1714_v43 = vld [vmem:[%s2221_s28 + $0x410] sm:$0xf]  ;;  %1711 = vst [vmem:[%s2226_s29 + $0x1f4] sm:$0xf] %v1710_v41  ;;  %1713 = vst [vmem:[%s2226_s29 + $0x200] sm:$0xf] %v1712_v42 }
  0x51   : > { %1715 = vst [vmem:[%s2226_s29 + $0x20c] sm:$0xf] %v1714_v43  ;;  %v1716_v44 = vld [vmem:[%s2221_s28 + $0x428] sm:$0xf]  ;;  %v1718_v45 = vld [vmem:[%s2221_s28 + $0x440] sm:$0xf] }
  0x52   : > { %v1720_v46 = vld [vmem:[%s2221_s28 + $0x458] sm:$0xf]  ;;  %1717 = vst [vmem:[%s2226_s29 + $0x218] sm:$0xf] %v1716_v44  ;;  %1719 = vst [vmem:[%s2226_s29 + $0x224] sm:$0xf] %v1718_v45 }
  0x53   : > { %1721 = vst [vmem:[%s2226_s29 + $0x230] sm:$0xf] %v1720_v46  ;;  %v1722_v47 = vld [vmem:[%s2221_s28 + $0x470] sm:$0xf]  ;;  %v1724_v48 = vld [vmem:[%s2221_s28 + $0x488] sm:$0xf] }
  0x54   : > { %v1726_v49 = vld [vmem:[%s2221_s28 + $0x4a0] sm:$0xf]  ;;  %1723 = vst [vmem:[%s2226_s29 + $0x23c] sm:$0xf] %v1722_v47  ;;  %1725 = vst [vmem:[%s2226_s29 + $0x248] sm:$0xf] %v1724_v48 }
  0x55   : > { %1727 = vst [vmem:[%s2226_s29 + $0x254] sm:$0xf] %v1726_v49  ;;  %v1728_v50 = vld [vmem:[%s2221_s28 + $0x4b8] sm:$0xf]  ;;  %v1730_v51 = vld [vmem:[%s2221_s28 + $0x4d0] sm:$0xf] }
  0x56   : > { %v1732_v52 = vld [vmem:[%s2221_s28 + $0x4e8] sm:$0xf]  ;;  %1729 = vst [vmem:[%s2226_s29 + $0x260] sm:$0xf] %v1728_v50  ;;  %1731 = vst [vmem:[%s2226_s29 + $0x26c] sm:$0xf] %v1730_v51 }
  0x57   : > { %1733 = vst [vmem:[%s2226_s29 + $0x278] sm:$0xf] %v1732_v52  ;;  %v1734_v53 = vld [vmem:[%s2221_s28 + $0x500] sm:$0xf]  ;;  %v1736_v54 = vld [vmem:[%s2221_s28 + $0x518] sm:$0xf] }
  0x58   : > { %v1738_v55 = vld [vmem:[%s2221_s28 + $0x530] sm:$0xf]  ;;  %1735 = vst [vmem:[%s2226_s29 + $0x284] sm:$0xf] %v1734_v53  ;;  %1737 = vst [vmem:[%s2226_s29 + $0x290] sm:$0xf] %v1736_v54 }
  0x59   : > { %1739 = vst [vmem:[%s2226_s29 + $0x29c] sm:$0xf] %v1738_v55  ;;  %v1740_v56 = vld [vmem:[%s2221_s28 + $0x548] sm:$0xf]  ;;  %v1742_v57 = vld [vmem:[%s2221_s28 + $0x560] sm:$0xf] }
  0x5a   : > { %v1744_v58 = vld [vmem:[%s2221_s28 + $0x578] sm:$0xf]  ;;  %1741 = vst [vmem:[%s2226_s29 + $0x2a8] sm:$0xf] %v1740_v56  ;;  %1743 = vst [vmem:[%s2226_s29 + $0x2b4] sm:$0xf] %v1742_v57 }
  0x5b   : > { %1745 = vst [vmem:[%s2226_s29 + $0x2c0] sm:$0xf] %v1744_v58  ;;  %v1746_v59 = vld [vmem:[%s2221_s28 + $0x590] sm:$0xf]  ;;  %v1748_v60 = vld [vmem:[%s2221_s28 + $0x5a8] sm:$0xf] }
  0x5c   : > { %v1750_v61 = vld [vmem:[%s2221_s28 + $0x5c0] sm:$0xf]  ;;  %1747 = vst [vmem:[%s2226_s29 + $0x2cc] sm:$0xf] %v1746_v59  ;;  %1749 = vst [vmem:[%s2226_s29 + $0x2d8] sm:$0xf] %v1748_v60 }
  0x5d   : > { %1751 = vst [vmem:[%s2226_s29 + $0x2e4] sm:$0xf] %v1750_v61  ;;  %v1752_v62 = vld [vmem:[%s2221_s28 + $0x5d8] sm:$0xf]  ;;  %v1754_v63 = vld [vmem:[%s2221_s28 + $0x5f0] sm:$0xf] }
  0x5e   : > { %1753 = vst [vmem:[%s2226_s29 + $0x2f0] sm:$0xf] %v1752_v62  ;;  %1755 = vst [vmem:[%s2226_s29 + $0x2fc] sm:$0xf] %v1754_v63 }
  0x5f PF: > { %p1756_p8 = scmp.ge.s32.totalorder %s2151_s16, 1  ;;  %p475_p9 = scmp.lt.s32.totalorder %s2151_s16, 3 }
  0x61   : > { %p476_p10 = pnand %p1756_p8, %p475_p9 }
  0x62   : > { %s482_s30 = sand.u32 (!%p476_p10), 1, %s2135_s12   ;;  %s532_s20 = smul.u32 (!%p476_p10), 3, %s2143_s14 }
  0x63   : > { %479 = sbr.rel (%p476_p10) target bundleno = 449 (0x1c1), region = 54 }
  0x64   : > { %s1913_s4 = smul.u32 (!%p476_p10), 768, %s482_s30  ;;  %p533_p11 = scmp.lt.s32.totalorder (!%p476_p10), %s532_s20, 5 }
  0x65   : > { %s1914_s26 = smul.u32 (!%p476_p10), 48, %s482_s30 }
  0x66   : > { %s2497_s9 = scalar_lea.vmem (!%p476_p10), [#allocation3], %s1913_s4 }
  0x67   : > { %s2618_s27 = scalar_lea.vmem (!%p476_p10), [#allocation4], %s1914_s26 }
  0x68   : > { %v2489_v0 = vld [vmem:[%s2653_s0 + $0x4] ss:$16 sps:$4 sm:$0xff]   ;;  %v2494_v1 = vld [vmem:[%s2653_s0 + $0xc] ss:$16 sps:$4 sm:$0xff]   ;;  %s2665_s20 = smov (!%p533_p11, %s532_s20), 5  ;;  %s1867_s12 = smul.u32 (%p2208_p6), 24, %s2143_s14 }
  0x69   : > { %1252 = vmatprep.mubr.bf16.mxu0 %v2489_v0  ;;  %v1955_v2 = vld [vmem:[%s2497_s9 + $0xac] ss:$12 sps:$4 sm:$0xff]   ;;  %1295 = vmatprep.mubr.bf16.mxu1 %v2494_v1  ;;  %v1959_v4 = vld [vmem:[%s2497_s9 + $0xa8] ss:$12 sps:$4 sm:$0xff]   ;;  %v1965_v8 = vld [vmem:[%s2497_s9 + $0x90] ss:$12 sps:$4 sm:$0xff]   ;;  %s535_s25 = scalar_lea.vmem %s2655_s2, %s2665_s20 }
  0x6a   : > { %v1957_v3 = vld [vmem:[%s2497_s9 + $0x22c] ss:$12 sps:$4 sm:$0xff]   ;;  %1220 = vmatprep.subr.bf16.mxu0 %v1955_v2  ;;  %v1960_v5 = vld [vmem:[%s2497_s9 + $0x228] ss:$12 sps:$4 sm:$0xff]   ;;  %v1966_v9 = vld [vmem:[%s2497_s9 + $0x210] ss:$12 sps:$4 sm:$0xff]   ;;  %s1486_s30 = scalar_lea.vmem (%p2208_p6), %s2656_s3, %s1867_s12 }
  0x6b   : > { %1263 = vmatprep.subr.bf16.mxu1 %v1957_v3  ;;  %v1961_v6 = vld [vmem:[%s2497_s9 + $0x94] ss:$12 sps:$4 sm:$0xff]   ;;  %1221 = vmatpush1.bf16.msra.mxu0 %v1959_v4  ;;  %v1967_v10 = vld [vmem:[%s2497_s9 + $0x7c] ss:$12 sps:$4 sm:$0xff]   ;;  %v1971_v12 = vld [vmem:[%s2497_s9 + $0x78] ss:$12 sps:$4 sm:$0xff]  }
  0x6c   : > { %1264 = vmatpush1.bf16.msra.mxu1 %v1960_v5  ;;  %v1963_v7 = vld [vmem:[%s2497_s9 + $0x214] ss:$12 sps:$4 sm:$0xff]   ;;  %1222 = vmatprep.subr.bf16.mxu0 %v1961_v6  ;;  %v1969_v11 = vld [vmem:[%s2497_s9 + $0x1fc] ss:$12 sps:$4 sm:$0xff]   ;;  %v1972_v13 = vld [vmem:[%s2497_s9 + $0x1f8] ss:$12 sps:$4 sm:$0xff]  }
  0x6d   : > { %1265 = vmatprep.subr.bf16.mxu1 %v1963_v7  ;;  %v1973_v14 = vld [vmem:[%s2497_s9 + $0x64] ss:$12 sps:$4 sm:$0xff]   ;;  %v1977_v16 = vld [vmem:[%s2497_s9 + $0x60] ss:$12 sps:$4 sm:$0xff]   ;;  %v1983_v20 = vld [vmem:[%s2497_s9 + $0x48] ss:$12 sps:$4 sm:$0xff]  }
  0x6e   : > { %v1975_v15 = vld [vmem:[%s2497_s9 + $0x1e4] ss:$12 sps:$4 sm:$0xff]   ;;  %v1978_v17 = vld [vmem:[%s2497_s9 + $0x1e0] ss:$12 sps:$4 sm:$0xff]   ;;  %v1984_v21 = vld [vmem:[%s2497_s9 + $0x1c8] ss:$12 sps:$4 sm:$0xff]  }
  0x6f   : > { %1223 = vmatpush1.bf16.msra.mxu0 %v1965_v8  ;;  %v1979_v18 = vld [vmem:[%s2497_s9 + $0x4c] ss:$12 sps:$4 sm:$0xff]   ;;  %v1985_v22 = vld [vmem:[%s2497_s9 + $0x34] ss:$12 sps:$4 sm:$0xff]   ;;  %v1989_v24 = vld [vmem:[%s2497_s9 + $0x30] ss:$12 sps:$4 sm:$0xff]  }
  0x70   : > { %1266 = vmatpush1.bf16.msra.mxu1 %v1966_v9  ;;  %1224 = vmatprep.subr.bf16.mxu0 %v1967_v10  ;;  %v1981_v19 = vld [vmem:[%s2497_s9 + $0x1cc] ss:$12 sps:$4 sm:$0xff]   ;;  %v1987_v23 = vld [vmem:[%s2497_s9 + $0x1b4] ss:$12 sps:$4 sm:$0xff]   ;;  %v1990_v25 = vld [vmem:[%s2497_s9 + $0x1b0] ss:$12 sps:$4 sm:$0xff]  }
  0x71   : > { %1267 = vmatprep.subr.bf16.mxu1 %v1969_v11  ;;  %v1991_v26 = vld [vmem:[%s2497_s9 + $0x1c] ss:$12 sps:$4 sm:$0xff]   ;;  %v1995_v28 = vld [vmem:[%s2497_s9 + $0x18] ss:$12 sps:$4 sm:$0xff]   ;;  %v2001_v32 = vld [vmem:[%s2497_s9] ss:$12 sps:$4 sm:$0xff]  }
  0x72   : > { %v1993_v27 = vld [vmem:[%s2497_s9 + $0x19c] ss:$12 sps:$4 sm:$0xff]   ;;  %v1996_v29 = vld [vmem:[%s2497_s9 + $0x198] ss:$12 sps:$4 sm:$0xff]   ;;  %v2002_v33 = vld [vmem:[%s2497_s9 + $0x180] ss:$12 sps:$4 sm:$0xff]  }
  0x73   : > { %1225 = vmatpush1.bf16.msra.mxu0 %v1971_v12  ;;  %v1997_v30 = vld [vmem:[%s2497_s9 + $0x4] ss:$12 sps:$4 sm:$0xff]   ;;  %v2003_v34 = vld [vmem:[%s2497_s9 + $0x16c] ss:$12 sps:$4 sm:$0xff]   ;;  %v2007_v36 = vld [vmem:[%s2497_s9 + $0x168] ss:$12 sps:$4 sm:$0xff]  }
  0x74   : > { %1268 = vmatpush1.bf16.msra.mxu1 %v1972_v13  ;;  %1226 = vmatprep.subr.bf16.mxu0 %v1973_v14  ;;  %v1999_v31 = vld [vmem:[%s2497_s9 + $0x184] ss:$12 sps:$4 sm:$0xff]   ;;  %v2005_v35 = vld [vmem:[%s2497_s9 + $0x2ec] ss:$12 sps:$4 sm:$0xff]   ;;  %v2008_v37 = vld [vmem:[%s2497_s9 + $0x2e8] ss:$12 sps:$4 sm:$0xff]  }
  0x75   : > { %1269 = vmatprep.subr.bf16.mxu1 %v1975_v15  ;;  %v2009_v38 = vld [vmem:[%s2497_s9 + $0x154] ss:$12 sps:$4 sm:$0xff]   ;;  %v2013_v40 = vld [vmem:[%s2497_s9 + $0x150] ss:$12 sps:$4 sm:$0xff]   ;;  %v2019_v44 = vld [vmem:[%s2497_s9 + $0x138] ss:$12 sps:$4 sm:$0xff]  }
  0x76   : > { %v2011_v39 = vld [vmem:[%s2497_s9 + $0x2d4] ss:$12 sps:$4 sm:$0xff]   ;;  %v2014_v41 = vld [vmem:[%s2497_s9 + $0x2d0] ss:$12 sps:$4 sm:$0xff]   ;;  %v2020_v45 = vld [vmem:[%s2497_s9 + $0x2b8] ss:$12 sps:$4 sm:$0xff]  }
  0x77   : > { %1227 = vmatpush1.bf16.msra.mxu0 %v1977_v16  ;;  %v2015_v42 = vld [vmem:[%s2497_s9 + $0x13c] ss:$12 sps:$4 sm:$0xff]   ;;  %v2021_v46 = vld [vmem:[%s2497_s9 + $0x124] ss:$12 sps:$4 sm:$0xff]   ;;  %v2025_v48 = vld [vmem:[%s2497_s9 + $0x120] ss:$12 sps:$4 sm:$0xff]  }
  0x78   : > { %1270 = vmatpush1.bf16.msra.mxu1 %v1978_v17  ;;  %1228 = vmatprep.subr.bf16.mxu0 %v1979_v18  ;;  %v2017_v43 = vld [vmem:[%s2497_s9 + $0x2bc] ss:$12 sps:$4 sm:$0xff]   ;;  %v2023_v47 = vld [vmem:[%s2497_s9 + $0x2a4] ss:$12 sps:$4 sm:$0xff]   ;;  %v2026_v49 = vld [vmem:[%s2497_s9 + $0x2a0] ss:$12 sps:$4 sm:$0xff]  }
  0x79   : > { %1271 = vmatprep.subr.bf16.mxu1 %v1981_v19  ;;  %v2027_v50 = vld [vmem:[%s2497_s9 + $0x10c] ss:$12 sps:$4 sm:$0xff]   ;;  %v2031_v52 = vld [vmem:[%s2497_s9 + $0x108] ss:$12 sps:$4 sm:$0xff]   ;;  %v2037_v56 = vld [vmem:[%s2497_s9 + $0xf0] ss:$12 sps:$4 sm:$0xff]  }
  0x7a   : > { %v2029_v51 = vld [vmem:[%s2497_s9 + $0x28c] ss:$12 sps:$4 sm:$0xff]   ;;  %v2032_v53 = vld [vmem:[%s2497_s9 + $0x288] ss:$12 sps:$4 sm:$0xff]   ;;  %v2038_v57 = vld [vmem:[%s2497_s9 + $0x270] ss:$12 sps:$4 sm:$0xff]  }
  0x7b   : > { %1229 = vmatpush1.bf16.msra.mxu0 %v1983_v20  ;;  %v2033_v54 = vld [vmem:[%s2497_s9 + $0xf4] ss:$12 sps:$4 sm:$0xff]   ;;  %v2039_v58 = vld [vmem:[%s2497_s9 + $0xdc] ss:$12 sps:$4 sm:$0xff]   ;;  %v2043_v60 = vld [vmem:[%s2497_s9 + $0xd8] ss:$12 sps:$4 sm:$0xff]  }
  0x7c   : > { %1272 = vmatpush1.bf16.msra.mxu1 %v1984_v21  ;;  %1230 = vmatprep.subr.bf16.mxu0 %v1985_v22  ;;  %v2035_v55 = vld [vmem:[%s2497_s9 + $0x274] ss:$12 sps:$4 sm:$0xff]   ;;  %v2041_v59 = vld [vmem:[%s2497_s9 + $0x25c] ss:$12 sps:$4 sm:$0xff]   ;;  %v2044_v61 = vld [vmem:[%s2497_s9 + $0x258] ss:$12 sps:$4 sm:$0xff]  }
  0x7d   : > { %1273 = vmatprep.subr.bf16.mxu1 %v1987_v23  ;;  %v2045_v62 = vld [vmem:[%s2497_s9 + $0xc4] ss:$12 sps:$4 sm:$0xff]   ;;  %v2049_v2 = vld [vmem:[%s2497_s9 + $0xc0] ss:$12 sps:$4 sm:$0xff]   ;;  %v2573_v6 = vld [vmem:[%s2653_s0 + $0x8] ss:$16 sps:$4 sm:$0xff]  }
  0x7e   : > { %v2047_v63 = vld [vmem:[%s2497_s9 + $0x244] ss:$12 sps:$4 sm:$0xff]   ;;  %v2050_v3 = vld [vmem:[%s2497_s9 + $0x240] ss:$12 sps:$4 sm:$0xff]   ;;  %v2069_v18 = vld [vmem:[%s2497_s9 + $0x128] ss:$12 sps:$4 sm:$0xff]  }
  0x7f   : > { %1231 = vmatpush1.bf16.msra.mxu0 %v1989_v24  ;;  %v2057_v4 = vld [vmem:[%s2497_s9 + $0x170] ss:$12 sps:$4 sm:$0xff]   ;;  %v2061_v10 = vld [vmem:[%s2497_s9 + $0x158] ss:$12 sps:$4 sm:$0xff]   ;;  %v2065_v14 = vld [vmem:[%s2497_s9 + $0x140] ss:$12 sps:$4 sm:$0xff]  }
  0x80   : > { %1274 = vmatpush1.bf16.msra.mxu1 %v1990_v25  ;;  %1232 = vmatprep.subr.bf16.mxu0 %v1991_v26  ;;  %v2568_v5 = vld [vmem:[%s2653_s0] ss:$16 sps:$4 sm:$0xff]   ;;  %v2062_v11 = vld [vmem:[%s2497_s9 + $0x2d8] ss:$12 sps:$4 sm:$0xff]   ;;  %v2070_v19 = vld [vmem:[%s2497_s9 + $0x2a8] ss:$12 sps:$4 sm:$0xff]  }
  0x81   : > { %1275 = vmatprep.subr.bf16.mxu1 %v1993_v27  ;;  %v2058_v7 = vld [vmem:[%s2497_s9 + $0x2f0] ss:$12 sps:$4 sm:$0xff]   ;;  %v2063_v12 = vld [vmem:[%s2497_s9 + $0x98] ss:$12 sps:$4 sm:$0xff]   ;;  %v2066_v15 = vld [vmem:[%s2497_s9 + $0x2c0] ss:$12 sps:$4 sm:$0xff]  }
  0x82   : > { %v2059_v8 = vld [vmem:[%s2497_s9 + $0xb0] ss:$12 sps:$4 sm:$0xff]   ;;  %v2064_v13 = vld [vmem:[%s2497_s9 + $0x218] ss:$12 sps:$4 sm:$0xff]   ;;  %v2067_v16 = vld [vmem:[%s2497_s9 + $0x80] ss:$12 sps:$4 sm:$0xff]  }
  0x83   : > { %1233 = vmatpush1.bf16.msra.mxu0 %v1995_v28  ;;  %v2060_v9 = vld [vmem:[%s2497_s9 + $0x230] ss:$12 sps:$4 sm:$0xff]   ;;  %v2068_v17 = vld [vmem:[%s2497_s9 + $0x200] ss:$12 sps:$4 sm:$0xff]   ;;  %v2071_v20 = vld [vmem:[%s2497_s9 + $0x68] ss:$12 sps:$4 sm:$0xff]  }
  0x84   : > { %1276 = vmatpush1.bf16.msra.mxu1 %v1996_v29  ;;  %1234 = vmatprep.subr.bf16.mxu0 %v1997_v30  ;;  %v2072_v21 = vld [vmem:[%s2497_s9 + $0x1e8] ss:$12 sps:$4 sm:$0xff]   ;;  %v2075_v22 = vld [vmem:[%s2497_s9 + $0x50] ss:$12 sps:$4 sm:$0xff]   ;;  %v2077_v24 = vld [vmem:[%s2497_s9 + $0xf8] ss:$12 sps:$4 sm:$0xff]  }
  0x85   : > { %1277 = vmatprep.subr.bf16.mxu1 %v1999_v31  ;;  %v2076_v23 = vld [vmem:[%s2497_s9 + $0x1d0] ss:$12 sps:$4 sm:$0xff]   ;;  %v2078_v25 = vld [vmem:[%s2497_s9 + $0x278] ss:$12 sps:$4 sm:$0xff]   ;;  %v2081_v28 = vld [vmem:[%s2497_s9 + $0xe0] ss:$12 sps:$4 sm:$0xff]  }
  0x86   : > { %v2079_v26 = vld [vmem:[%s2497_s9 + $0x38] ss:$12 sps:$4 sm:$0xff]   ;;  %v2082_v29 = vld [vmem:[%s2497_s9 + $0x260] ss:$12 sps:$4 sm:$0xff]  }
  0x87   : > { %1235 = vmatpush1.bf16.msra.mxu0 %v2001_v32  ;;  %v2080_v27 = vld [vmem:[%s2497_s9 + $0x1b8] ss:$12 sps:$4 sm:$0xff]   ;;  %v2083_v30 = vld [vmem:[%s2497_s9 + $0x20] ss:$12 sps:$4 sm:$0xff]   ;;  %v2085_v32 = vld [vmem:[%s2497_s9 + $0xc8] ss:$12 sps:$4 sm:$0xff]  }
  0x88   : > { %1278 = vmatpush1.bf16.msra.mxu1 %v2002_v33  ;;  %1236 = vmatprep.subr.bf16.mxu0 %v2003_v34  ;;  %v2084_v31 = vld [vmem:[%s2497_s9 + $0x1a0] ss:$12 sps:$4 sm:$0xff]   ;;  %v2086_v33 = vld [vmem:[%s2497_s9 + $0x248] ss:$12 sps:$4 sm:$0xff]  }
  0x89   : > { %1279 = vmatprep.subr.bf16.mxu1 %v2005_v35  ;;  %v2087_v34 = vld [vmem:[%s2497_s9 + $0x8] ss:$12 sps:$4 sm:$0xff]  }
  0x8a   : > { %v2088_v35 = vld [vmem:[%s2497_s9 + $0x188] ss:$12 sps:$4 sm:$0xff]  }
  0x8b   : > { %1237 = vmatpush2.bf16.msra.mxu0 %v2007_v36  ;;  %v1411_v36 = vlaneseq }
  0x8c   : > { %1280 = vmatpush2.bf16.msra.mxu1 %v2008_v37  ;;  %1238 = vmatprep.subr.bf16.mxu0 %v2009_v38 }
  0x8d   : > { %1281 = vmatprep.subr.bf16.mxu1 %v2011_v39  ;;  %v1412_v37 = vshrl.u32 %v1411_v36, 7  ;;  %v1409_v39 = vld [vmem:[%s535_s25] sm:$0x7] }
  0x8f   : > { %1239 = vmatpush2.bf16.msra.mxu0 %v2013_v40  ;;  %v1413_v38 = vsub.s32 0, %v1412_v37  ;;  %v1417_v40 = vsub.s32 1, %v1412_v37 }
  0x90   : > { %1282 = vmatpush2.bf16.msra.mxu1 %v2014_v41  ;;  %1240 = vmatprep.subr.bf16.mxu0 %v2015_v42 }
  0x91   : > { %1283 = vmatprep.subr.bf16.mxu1 %v2017_v43  ;;  %v1414_v41 = vrot.slane %v1409_v39, %v1413_v38 }
  0x93   : > { %1241 = vmatpush2.bf16.msra.mxu0 %v2019_v44 }
  0x94   : > { %1284 = vmatpush2.bf16.msra.mxu1 %v2020_v45  ;;  %1242 = vmatprep.subr.bf16.mxu0 %v2021_v46  ;;  %v1418_v45 = vrot.slane %v1409_v39, %v1417_v40 }
  0x95   : > { %1285 = vmatprep.subr.bf16.mxu1 %v2023_v47 }
  0x97   : > { %1243 = vmatpush2.bf16.msra.mxu0 %v2025_v48 }
  0x98   : > { %1286 = vmatpush2.bf16.msra.mxu1 %v2026_v49  ;;  %1244 = vmatprep.subr.bf16.mxu0 %v2027_v50 }
  0x99   : > { %1287 = vmatprep.subr.bf16.mxu1 %v2029_v51 }
  0x9b   : > { %1245 = vmatpush2.bf16.msra.mxu0 %v2031_v52 }
  0x9c   : > { %1288 = vmatpush2.bf16.msra.mxu1 %v2032_v53  ;;  %1246 = vmatprep.subr.bf16.mxu0 %v2033_v54 }
  0x9d   : > { %1289 = vmatprep.subr.bf16.mxu1 %v2035_v55 }
  0x9f   : > { %1247 = vmatpush2.bf16.msra.mxu0 %v2037_v56 }
  0xa0   : > { %1290 = vmatpush2.bf16.msra.mxu1 %v2038_v57  ;;  %1248 = vmatprep.subr.bf16.mxu0 %v2039_v58 }
  0xa1   : > { %1291 = vmatprep.subr.bf16.mxu1 %v2041_v59 }
  0xa3   : > { %1249 = vmatpush2.bf16.msra.mxu0 %v2043_v60 }
  0xa4   : > { %1292 = vmatpush2.bf16.msra.mxu1 %v2044_v61  ;;  %1250 = vmatprep.subr.bf16.mxu0 %v2045_v62 }
  0xa5   : > { %1293 = vmatprep.subr.bf16.mxu1 %v2047_v63 }
  0xa7   : > { %1251 = vmatpush2.bf16.msra.mxu0 %v2049_v2 }
  0xa8   : > { %1294 = vmatpush2.bf16.msra.mxu1 %v2050_v3  ;;  %1868 = vmatprep.subr.bf16.mxu0 %v2057_v4 }
  0xa9   : > { %1890 = vmatprep.subr.bf16.mxu1 %v2058_v7 }
  0xaa   : > { %1253 = vmatmul.mubr.bf16.vlgmr.msra.gmra.mxu0 %v2568_v5 }
  0xab   : > { %1296 = vmatmul.mubr.bf16.vlgmr.msra.gmra.mxu1 %v2573_v6  ;;  %1869 = vmatpush3.bf16.msra.mxu0 %v2059_v8 }
  0xac   : > { %1891 = vmatpush3.bf16.msra.mxu1 %v2060_v9  ;;  %1870 = vmatprep.subr.bf16.mxu0 %v2061_v10  ;;  %v1421_v9 = vsub.s32 2, %v1412_v37 }
  0xad   : > { %1892 = vmatprep.subr.bf16.mxu1 %v2062_v11  ;;  %1338 = vmatprep.mubr.bf16.mxu0 %v2489_v0  ;;  %v2073_v0 = vld [vmem:[%s2497_s9 + $0x110] ss:$12 sps:$4 sm:$0xff]  }
  0xae   : > { %1379 = vmatprep.mubr.bf16.mxu1 %v2494_v1  ;;  %v2074_v1 = vld [vmem:[%s2497_s9 + $0x290] ss:$12 sps:$4 sm:$0xff]  }
  0xaf   : > { %1871 = vmatpush3.bf16.msra.mxu0 %v2063_v12 }
  0xb0   : > { %1893 = vmatpush3.bf16.msra.mxu1 %v2064_v13  ;;  %1872 = vmatprep.subr.bf16.mxu0 %v2065_v14 }
  0xb1   : > { %1894 = vmatprep.subr.bf16.mxu1 %v2066_v15 }
  0xb3   : > { %1873 = vmatpush3.bf16.msra.mxu0 %v2067_v16  ;;  %v1422_v16 = vrot.slane %v1409_v39, %v1421_v9 }
  0xb4   : > { %1895 = vmatpush3.bf16.msra.mxu1 %v2068_v17  ;;  %1874 = vmatprep.subr.bf16.mxu0 %v2069_v18 }
  0xb5   : > { %1896 = vmatprep.subr.bf16.mxu1 %v2070_v19 }
  0xb7   : > { %1875 = vmatpush3.bf16.msra.mxu0 %v2071_v20 }
  0xb8   : > { %1897 = vmatpush3.bf16.msra.mxu1 %v2072_v21  ;;  %1876 = vmatprep.subr.bf16.mxu0 %v2073_v0 }
  0xb9   : > { %1898 = vmatprep.subr.bf16.mxu1 %v2074_v1 }
  0xbb   : > { %1877 = vmatpush3.bf16.msra.mxu0 %v2075_v22 }
  0xbc   : > { %1899 = vmatpush3.bf16.msra.mxu1 %v2076_v23  ;;  %1878 = vmatprep.subr.bf16.mxu0 %v2077_v24 }
  0xbd   : > { %1900 = vmatprep.subr.bf16.mxu1 %v2078_v25 }
  0xbf   : > { %1879 = vmatpush3.bf16.msra.mxu0 %v2079_v26 }
  0xc0   : > { %1901 = vmatpush3.bf16.msra.mxu1 %v2080_v27  ;;  %1880 = vmatprep.subr.bf16.mxu0 %v2081_v28 }
  0xc1   : > { %1902 = vmatprep.subr.bf16.mxu1 %v2082_v29 }
  0xc3   : > { %1881 = vmatpush3.bf16.msra.mxu0 %v2083_v30 }
  0xc4   : > { %1903 = vmatpush3.bf16.msra.mxu1 %v2084_v31  ;;  %1882 = vmatprep.subr.bf16.mxu0 %v2085_v32 }
  0xc5   : > { %1904 = vmatprep.subr.bf16.mxu1 %v2086_v33 }
  0xc7   : > { %1883 = vmatpush3.bf16.msra.mxu0 %v2087_v34 }
  0xc8   : > { %1905 = vmatpush3.bf16.msra.mxu1 %v2088_v35 }
  0xca   : > { %1339 = vmatmul.mubr.bf16.vlgmr.msra.gmra.mxu0 %v2568_v5 }
  0xcb   : > { %1380 = vmatmul.mubr.bf16.vlgmr.msra.gmra.mxu1 %v2573_v6 }
 0x16a   : > { %v1254_v42 = vpop.f32.mrf.mxu0 }
 0x16b   : > { %v1297_v43 = vpop.f32.mrf.mxu1 }
 0x16c   : > { %v1298_v44 = vadd.f32 %v1297_v43, %v1254_v42  ;;  %v1256_v46 = vpop.f32.mrf.mxu0 }
 0x16d   : > { %v1299_v47 = vpop.f32.mrf.mxu1 }
 0x16e   : > { %v1426_v48 = vadd.f32 %v1414_v41, %v1298_v44  ;;  %v1300_v49 = vadd.f32 %v1299_v47, %v1256_v46  ;;  %v1258_v50 = vpop.f32.mrf.mxu0 }
 0x16f   : > { %v1301_v51 = vpop.f32.mrf.mxu1 }
 0x170   : > { %v1857_v52 = vmul.f32 -1.442695, %v1426_v48  ;;  %v1427_v53 = vadd.f32 %v1418_v45, %v1300_v49  ;;  %v1302_v54 = vadd.f32 %v1301_v51, %v1258_v50  ;;  %v1260_v55 = vpop.f32.mrf.mxu0 }
 0x171   : > { %v1303_v56 = vpop.f32.mrf.mxu1 }
 0x172   : > { %2089 = vpow2.f32 %v1857_v52  ;;  %v1858_v57 = vmul.f32 -1.442695, %v1427_v53  ;;  %v1429_v58 = vadd.f32 %v1414_v41, %v1302_v54  ;;  %v1304_v59 = vadd.f32 %v1303_v56, %v1260_v55 }
 0x174   : > { %2091 = vpow2.f32 %v1858_v57  ;;  %v1860_v60 = vmul.f32 -1.442695, %v1429_v58  ;;  %v1430_v61 = vadd.f32 %v1418_v45, %v1304_v59 }
 0x176   : > { %2093 = vpow2.f32 %v1860_v60  ;;  %v1861_v62 = vmul.f32 -1.442695, %v1430_v61 }
 0x178   : > { %2095 = vpow2.f32 %v1861_v62 }
 0x17f   : > { %v2090_v63 = vpop.eup %2089 }
 0x180   : > { %v1450_v2 = vadd.f32 1.0, %v2090_v63 }
 0x181   : > { %v2092_v3 = vpop.eup %2091 }
 0x182   : > { %2097 = vrcp.f32 %v1450_v2  ;;  %v1451_v4 = vadd.f32 1.0, %v2092_v3 }
 0x183   : > { %v2094_v5 = vpop.eup %2093 }
 0x184   : > { %2099 = vrcp.f32 %v1451_v4  ;;  %v1453_v6 = vadd.f32 1.0, %v2094_v5 }
 0x185   : > { %v2096_v7 = vpop.eup %2095 }
 0x186   : > { %2101 = vrcp.f32 %v1453_v6  ;;  %v1454_v8 = vadd.f32 1.0, %v2096_v7 }
 0x188   : > { %2103 = vrcp.f32 %v1454_v8 }
 0x18a   : > { %v1884_v10 = vpop.f32.mrf.mxu0 }
 0x18b   : > { %v1906_v11 = vpop.f32.mrf.mxu1 }
 0x18c   : > { %v1885_v12 = vpop.f32.mrf.mxu0 }
 0x18d   : > { %v1907_v13 = vpop.f32.mrf.mxu1  ;;  %v1886_v14 = vadd.f32 %v1885_v12, %v1884_v10 }
 0x18e   : > { %v1908_v15 = vadd.f32 %v1907_v13, %v1906_v11  ;;  %v1887_v18 = vpop.f32.mrf.mxu0 }
 0x18f   : > { %v2098_v17 = vpop.eup %2097  ;;  %v1909_v19 = vpop.f32.mrf.mxu1 }
 0x190   : > { %1468 = vst [vmem:[%s2618_s27] sm:$0xff] %v2098_v17  ;;  %v1382_v20 = vadd.f32 %v1908_v15, %v1886_v14  ;;  %v1888_v0 = vpop.f32.mrf.mxu0 }
 0x191   : > { %v2100_v21 = vpop.eup %2099  ;;  %v1910_v1 = vpop.f32.mrf.mxu1  ;;  %v1889_v23 = vadd.f32 %v1888_v0, %v1887_v18 }
 0x192   : > { %1469 = vst [vmem:[%s2618_s27 + $0x8] sm:$0xff] %v2100_v21  ;;  %v1428_v22 = vadd.f32 %v1422_v16, %v1382_v20  ;;  %v1911_v24 = vadd.f32 %v1910_v1, %v1909_v19 }
 0x193   : > { %v2102_v25 = vpop.eup %2101 }
 0x194   : > { %1471 = vst [vmem:[%s2618_s27 + $0x18] sm:$0xff] %v2102_v25  ;;  %v1859_v26 = vmul.f32 -1.442695, %v1428_v22  ;;  %v1385_v27 = vadd.f32 %v1911_v24, %v1889_v23 }
 0x195   : > { %v2104_v28 = vpop.eup %2103 }
 0x196   : > { %1472 = vst [vmem:[%s2618_s27 + $0x20] sm:$0xff] %v2104_v28  ;;  %2105 = vpow2.f32 %v1859_v26  ;;  %v1431_v29 = vadd.f32 %v1422_v16, %v1385_v27 }
 0x197   : > { %v1499_v37 = vld [vmem:[%s2618_s27] sm:$0xff] (%p2208_p6) }
 0x198   : > { %v1862_v30 = vmul.f32 -1.442695, %v1431_v29  ;;  %1500 = vst [vmem:[%s1486_s30] sm:$0xff] (%p2208_p6), %v1499_v37 }
 0x199   : > { %v1501_v38 = vld [vmem:[%s2618_s27 + $0x8] sm:$0xff] (%p2208_p6) }
 0x19a   : > { %2107 = vpow2.f32 %v1862_v30  ;;  %1502 = vst [vmem:[%s1486_s30 + $0x8] sm:$0xff] (%p2208_p6), %v1501_v38 }
 0x19b   : > { %v1505_v40 = vld [vmem:[%s2618_s27 + $0x18] sm:$0xff] (%p2208_p6) }
 0x19c   : > { %1506 = vst [vmem:[%s1486_s30 + $0x30] sm:$0xff] (%p2208_p6), %v1505_v40 }
 0x19d   : > { %v1507_v41 = vld [vmem:[%s2618_s27 + $0x20] sm:$0xff] (%p2208_p6) }
 0x19e   : > { %1508 = vst [vmem:[%s1486_s30 + $0x38] sm:$0xff] (%p2208_p6), %v1507_v41 }
 0x1a3   : > { %v2106_v31 = vpop.eup %2105 }
 0x1a4   : > { %v1452_v32 = vadd.f32 1.0, %v2106_v31 }
 0x1a6   : > { %2109 = vrcp.f32 %v1452_v32 }
 0x1a7   : > { %v2108_v33 = vpop.eup %2107 }
 0x1a8   : > { %v1455_v34 = vadd.f32 1.0, %v2108_v33 }
 0x1aa   : > { %2111 = vrcp.f32 %v1455_v34 }
 0x1b3   : > { %v2110_v35 = vpop.eup %2109 }
 0x1b4   : > { %1470 = vst [vmem:[%s2618_s27 + $0x10] sm:$0xff] %v2110_v35  ;;  %1480 = sbr.rel (!%p2208_p6) target bundleno = 449 (0x1c1), region = 70 }
 0x1b7   : > { %v2112_v36 = vpop.eup %2111 }
 0x1b8   : > { %1473 = vst [vmem:[%s2618_s27 + $0x28] sm:$0xff] %v2112_v36 }
 0x1bb   : > { %v1503_v39 = vld [vmem:[%s2618_s27 + $0x10] sm:$0xff] }
 0x1bc   : > { %1504 = vst [vmem:[%s1486_s30 + $0x10] sm:$0xff] %v1503_v39 }
 0x1bf   : > { %v1509_v42 = vld [vmem:[%s2618_s27 + $0x28] sm:$0xff] }
 0x1c0   : > { %1510 = vst [vmem:[%s1486_s30 + $0x40] sm:$0xff] %v1509_v42 }
 0x1c1 PF: > { %s13_s16 = sadd.s32 1, %s2151_s16   ;;  %s2658_s12 = smov %s2139_s13 }
 0x1c2   : > { %p10_p12 = scmp.ge.s32.totalorder %s13_s16, 4   ;;  %s2659_s13 = smov %s2213_s22 }
 0x1c3   : > { %s2660_s14 = smov %s2147_s15  ;;  %s2661_s15 = smov %s2663_s17 }
 0x1c4   :  { %12 = sbr.rel (!%p10_p12) target bundleno = 3 (0x3), region = 136 }

// kernel: _lambda_.9
= control target key start
LH: loop header
LB: loop body
LE: loop exit
PB: predicated region body
PF: predicated region fallthrough
CT: control target
= control target key end

     0   :  { %vm16_vm0 = vcmask 392192   ;;  %v114_v3 = vmov 0.0   ;;  %s158_s0 = inlined_call_operand.vmem [shape: f32[16,48], index: 0, kind: input, shape index: {}]   ;;  %s159_s1 = inlined_call_operand.vmem [shape: f32[16,48], index: 1, kind: input, shape index: {}]   ;;  %s160_s2 = inlined_call_operand.vmem [shape: f32[2], index: 2, kind: output, shape index: {}]  }
   0x1   :  { %v21_v0 = vld [vmem:[%s158_s0] sm:$0xff]  ;;  %v22_v1 = vld [vmem:[%s158_s0 + $0x8] sm:$0xff]  ;;  %17 = vst.msk [vmem:[#allocation2] sm:$0xff] %vm16_vm0, %v114_v3  ;;  %18 = vst.msk [vmem:[#allocation2 + $0x8] sm:$0xff] %vm16_vm0, %v114_v3 }
   0x2   :  { %v23_v2 = vld [vmem:[%s159_s1] sm:$0xff]  ;;  %v24_v4 = vld [vmem:[%s159_s1 + $0x8] sm:$0xff]  ;;  %19 = vst.msk [vmem:[#allocation3] sm:$0xff] %vm16_vm0, %v114_v3  ;;  %20 = vst.msk [vmem:[#allocation3 + $0x8] sm:$0xff] %vm16_vm0, %v114_v3 }
   0x3   :  { %v25_v5 = vsub.f32 %v21_v0, %v23_v2 }
   0x4   :  { %7 = vsyncpa [#allocation5], 0  ;;  %v26_v6 = vsub.f32 %v22_v1, %v24_v4  ;;  %s85_s18 = sshll.u32 %s160_s2, 4  ;;  %s86_s18 = int_to_ptr.vmem [resolvable:$true] %s85_s18 }
   0x5   :  { %v29_v7 = vmul.f32 %v25_v5, %v25_v5  ;;  %v38_v9 = vand.u32 2147483647, %v25_v5  ;;  %s100_s20 = scalar_lea.vmem %s86_s18, 16  ;;  %p105_p1 = scmp.lt.s32.totalorder %s86_s18, %s86_s18 }
   0x6   :  { %v30_v8 = vmul.f32 %v26_v6, %v26_v6  ;;  %v39_v10 = vand.u32 2147483647, %v26_v6  ;;  %p101_p0 = scmp.ne.s32.totalorder %s86_s18, %s100_s20  ;;  %p106_p2 = scmp.lt.s32.totalorder %s100_s20, %s100_s20 }
   0x8   :  { %v27_v11 = vld [vmem:[#allocation2] sm:$0xff]  ;;  %v28_v12 = vld [vmem:[#allocation2 + $0x8] sm:$0xff]  ;;  %p107_p3 = por %p106_p2, %p105_p1 }
   0x9   :  { %v36_v13 = vld [vmem:[#allocation3] sm:$0xff]  ;;  %v31_v14 = vadd.f32 %v29_v7, %v27_v11  ;;  %v32_v15 = vadd.f32 %v30_v8, %v28_v12  ;;  %v37_v16 = vld [vmem:[#allocation3 + $0x8] sm:$0xff] }
   0xa   :  { %v40_v17 = vadd.f32 %v38_v9, %v36_v13  ;;  %v41_v18 = vadd.f32 %v39_v10, %v37_v16  ;;  %p108_p4 = pnand %p107_p3, %p101_p0 }
   0xb   :  { %34 = vst.msk [vmem:[#allocation2] sm:$0xff] %vm16_vm0, %v31_v14  ;;  %35 = vst.msk [vmem:[#allocation2 + $0x8] sm:$0xff] %vm16_vm0, %v32_v15 }
   0xc   :  { %42 = vst.msk [vmem:[#allocation3] sm:$0xff] %vm16_vm0, %v40_v17  ;;  %43 = vst.msk [vmem:[#allocation3 + $0x8] sm:$0xff] %vm16_vm0, %v41_v18 }
  0x12   :  { %v47_v19 = vld [vmem:[#allocation2] sm:$0xff]  ;;  %v48_v20 = vld [vmem:[#allocation2 + $0x8] sm:$0xff] }
  0x13   :  { %v63_v21 = vld [vmem:[#allocation3] sm:$0xff]  ;;  %v49_v22 = vsel %vm16_vm0, %v47_v19, 0.0  ;;  %v50_v23 = vsel %vm16_vm0, %v48_v20, 0.0  ;;  %v64_v24 = vld [vmem:[#allocation3 + $0x8] sm:$0xff] }
  0x14   :  { %v65_v25 = vsel %vm16_vm0, %v63_v21, 0.0  ;;  %v51_v26 = vadd.f32 %v50_v23, %v49_v22  ;;  %v66_v27 = vsel %vm16_vm0, %v64_v24, 0.0 }
  0x15   :  { %v67_v28 = vadd.f32 %v66_v27, %v65_v25 }
  0x16   :  { %52 = vadd.xlane.f32.xlu0 %v51_v26 }
  0x1a   :  { %68 = vadd.xlane.f32.xlu0 %v67_v28 }
  0x9f   :  { %v53_v29 = vpop.xlane.xlu0 %52 }
  0xa0   :  { %v54_v30 = vrot.slane %v53_v29, 4 }
  0xa2   :  { %v55_v31 = vadd.f32 %v54_v30, %v53_v29 }
  0xa3   :  { %v69_v32 = vpop.xlane.xlu0 %68 }
  0xa4   :  { %v56_v33 = vrot.slane %v55_v31, 2  ;;  %v70_v34 = vrot.slane %v69_v32, 4 }
  0xa6   :  { %v71_v35 = vadd.f32 %v70_v34, %v69_v32  ;;  %v57_v36 = vadd.f32 %v56_v33, %v55_v31 }
  0xa8   :  { %v72_v37 = vrot.slane %v71_v35, 2  ;;  %v58_v38 = vrot.slane %v57_v36, 1 }
  0xaa   :  { %v73_v39 = vadd.f32 %v72_v37, %v71_v35  ;;  %v59_v40 = vadd.f32 %v58_v38, %v57_v36 }
  0xac   :  { %94 = vpush %v59_v40  ;;  %v74_v41 = vrot.slane %v73_v39, 1 }
  0xae   :  { %v75_v42 = vadd.f32 %v74_v41, %v73_v39 }
  0xb0   :  { %96 = vpush %v75_v42 }
  0xdd   :  { %s95_s0 = spop %94 }
  0xde   :  { %62 = sst [smem:[#allocation4]] %s95_s0 }
  0xe1   :  { %s97_s19 = spop %96 }
  0xe2   :  { %78 = sst [smem:[#allocation4 + $0x1]] %s97_s19 }
  0xe3   :  { %111 = shalt.err (!%p108_p4)
}
  0xe4   :  { %s115_s21 = smov [#allocation4]  }
  0xe5   :  { %88 = dma.smem_to_vmem %s115_s21, 16, %s86_s18, [#allocation5]  }
  0xe6   :  { %112 = dma.done.wait [#allocation5], 16  }
  0xe7   :  { %113 = vsyncadd [#allocation5], 4294967280 }
  0xe8   :  { %92 = sfence }
  0xe9   :  { %93 = vsyncpa [#allocation5], 1 }

</bundles_post_ra>
